<compile_context>
chip_gen: v7x
topology: tpu7x:2x2x1
jax: 0.10.0
libtpu: 0.0.40
codegen_flags: <defaults>
</compile_context>

<pallas_src>
import jax
import jax.numpy as jnp
from jax import lax
from jax.experimental import pallas as pl
from jax.experimental.pallas import tpu as pltpu


def _lstm_ctrl_kernel(x_ref,      # (T*Bp, I)   time-major rows, batch padded
                      w_ref,      # (I+3H, 4H)  [W_ih0; W_hh0; W_ih1; W_hh1]
                      b_ref,      # (4, 4H)     [b0; b1; bfc1 (padded); bfc2]
                      wh_ref,     # (H+1, H//2) [wfc1; wfc2^T]
                      out_ref):   # (Bp, 1)
    TB, I = x_ref.shape
    H4 = b_ref.shape[1]
    H = H4 // 4
    H2 = wh_ref.shape[1]
    Bp = out_ref.shape[0]
    T = TB // Bp

    # Static row slices of the packed weight slab (loaded once, stay in vregs).
    wih0 = w_ref[0:I, :]
    whh0 = w_ref[I:I + H, :]
    wih1 = w_ref[I + H:I + 2 * H, :]
    whh1 = w_ref[I + 2 * H:I + 3 * H, :]

    b0 = b_ref[0:1, :]
    b1 = b_ref[1:2, :]
    bfc1 = b_ref[2:3, 0:H2]
    bfc2 = b_ref[3:4, 0:1]

    # Hoisted layer-0 input projection for ALL timesteps (bias folded in):
    # one (T*Bp, I) @ (I, 4H) MXU op instead of T tiny matmuls in the chain.
    xg0 = jnp.dot(x_ref[...], wih0, preferred_element_type=jnp.float32) + b0

    # Pre-broadcast layer-1 bias once (no per-iteration broadcast_in_dim).
    b1b = jnp.broadcast_to(b1, (Bp, H4))

    def gates_to_hc(gates, c):
        # Gate layout (i, f, o, g): one sigmoid over the first 3H lanes,
        # one tanh for g, one tanh for the new cell state.
        sig = jax.nn.sigmoid(gates[:, :3 * H])
        i = sig[:, 0 * H:1 * H]
        f = sig[:, 1 * H:2 * H]
        o = sig[:, 2 * H:3 * H]
        g = jnp.tanh(gates[:, 3 * H:])
        c_new = f * c + i * g
        h_new = o * jnp.tanh(c_new)
        return h_new, c_new

    z = jnp.zeros((Bp, H), jnp.float32)
    h1, c1, h2, c2 = z, z, z, z

    # Fully unrolled time loop (T small & static): all slices 8-row aligned.
    # TODO(synk): inter-layer dropout omitted (train-mode only; eval has none).
    for t in range(T):
        # h2 is from step t-1 -> this half of layer-1's gates can overlap the
        # layer-0 recurrent matmul of the current step.
        g1_part = jnp.dot(h2, whh1, preferred_element_type=jnp.float32) + b1b
        g0 = xg0[t * Bp:(t + 1) * Bp, :] + jnp.dot(
            h1, whh0, preferred_element_type=jnp.float32)
        h1, c1 = gates_to_hc(g0, c1)
        g1 = jnp.dot(h1, wih1, preferred_element_type=jnp.float32) + g1_part
        h2, c2 = gates_to_hc(g1, c2)

    # Head: fc1 -> tanh -> fc2 -> tanh.  fc2 (N=1) as VPU mul + lane reduce
    # instead of an MXU push/pop on the critical tail.
    wfc1 = wh_ref[0:H, :]
    wfc2_row = wh_ref[H:H + 1, :]
    y = jnp.tanh(jnp.dot(h2, wfc1, preferred_element_type=jnp.float32) + bfc1)
    o = jnp.tanh(jnp.sum(y * wfc2_row, axis=-1, keepdims=True) + bfc2)
    out_ref[...] = o


def _permute_gates(w, H):
    """Permute last-dim gate blocks from PyTorch (i,f,g,o) to (i,f,o,g)."""
    return jnp.concatenate(
        [w[..., :2 * H], w[..., 3 * H:4 * H], w[..., 2 * H:3 * H]], axis=-1)


def prepare_params(params):
    """One-time weight prep (gate permutation + packing). Call ONCE, cache."""
    H = params["whh0"].shape[0]
    H4 = 4 * H
    H2 = params["wfc1"].shape[1]

    wih0 = _permute_gates(params["wih0"], H)
    whh0 = _permute_gates(params["whh0"], H)
    wih1 = _permute_gates(params["wih1"], H)
    whh1 = _permute_gates(params["whh1"], H)
    b0 = _permute_gates(params["b0"], H)
    b1 = _permute_gates(params["b1"], H)

    # Packed slabs -> 3 parameter DMAs at kernel entry instead of 10.
    w_lstm = jnp.concatenate([wih0, whh0, wih1, whh1],
                             axis=0).astype(jnp.float32)          # (I+3H, 4H)
    bfc1 = jnp.pad(params["bfc1"], ((0, 0), (0, H4 - H2)))
    bfc2 = jnp.pad(params["bfc2"], ((0, 0), (0, H4 - 1)))
    b_slab = jnp.concatenate([b0, b1, bfc1, bfc2],
                             axis=0).astype(jnp.float32)          # (4, 4H)
    w_head = jnp.concatenate([params["wfc1"], params["wfc2"].T],
                             axis=0).astype(jnp.float32)          # (H+1, H//2)
    return {"w_lstm": w_lstm, "b_slab": b_slab, "w_head": w_head}


def lstm_recovery_controller(x, prep):
    """x: (batch, seq, input_size) f32, prep: prepare_params(...) -> (batch, 1)."""
    B, T, I = x.shape
    Bp = max(8, ((B + 7) // 8) * 8)   # pad batch to the f32 sublane tile

    xp = jnp.pad(x.astype(jnp.float32), ((0, Bp - B), (0, 0), (0, 0)))
    # Time-major, flattened to (T*Bp, I): rows t*Bp:(t+1)*Bp are timestep t.
    x2d = jnp.transpose(xp, (1, 0, 2)).reshape(T * Bp, I)

    vmem = pl.BlockSpec(memory_space=pltpu.MemorySpace.VMEM)
    out = pl.pallas_call(
        _lstm_ctrl_kernel,
        out_shape=jax.ShapeDtypeStruct((Bp, 1), jnp.float32),
        in_specs=[vmem, vmem, vmem, vmem],
        out_specs=vmem,
    )(x2d, prep["w_lstm"], prep["b_slab"], prep["w_head"])
    return out[:B]


def make_params(key, input_size, hidden_size):
    """Deterministic parameter init mimicking PyTorch shapes.

    LSTM weights are stored pre-transposed for (B,K)@(K,N) matmuls, in the
    canonical PyTorch gate order (i,f,g,o), with the (b_ih + b_hh) bias pair
    folded into a single bias row.  prepare_params() handles permutation/packing.
    """
    H = hidden_size
    k = 1.0 / jnp.sqrt(H)
    keys = jax.random.split(key, 12)

    def u(kk, shape):
        return jax.random.uniform(kk, shape, jnp.float32, -k, k)

    return {
        # layer 0: input I -> hidden H
        "wih0": u(keys[0], (input_size, 4 * H)),
        "whh0": u(keys[1], (H, 4 * H)),
        "b0":   u(keys[2], (1, 4 * H)) + u(keys[3], (1, 4 * H)),
        # layer 1: hidden H -> hidden H
        "wih1": u(keys[4], (H, 4 * H)),
        "whh1": u(keys[5], (H, 4 * H)),
        "b1":   u(keys[6], (1, 4 * H)) + u(keys[7], (1, 4 * H)),
        # head
        "wfc1": u(keys[8], (H, H // 2)),
        "bfc1": u(keys[9], (1, H // 2)),
        "wfc2": u(keys[10], (H // 2, 1)),
        "bfc2": u(keys[11], (1, 1)),
    }


def reference_forward(x, params):
    """Plain-JAX reference (canonical PyTorch gate order), for sanity check."""
    H = params["whh0"].shape[0]

    def cell(x_t, h, c, wih, whh, b):
        g = x_t @ wih + h @ whh + b
        i = jax.nn.sigmoid(g[:, 0 * H:1 * H])
        f = jax.nn.sigmoid(g[:, 1 * H:2 * H])
        gg = jnp.tanh(g[:, 2 * H:3 * H])
        o = jax.nn.sigmoid(g[:, 3 * H:4 * H])
        c = f * c + i * gg
        h = o * jnp.tanh(c)
        return h, c

    B = x.shape[0]
    z = jnp.zeros((B, H), jnp.float32)

    def scan_fn(carry, x_t):
        h1, c1, h2, c2 = carry
        h1, c1 = cell(x_t, h1, c1, params["wih0"], params["whh0"], params["b0"])
        h2, c2 = cell(h1, h2, c2, params["wih1"], params["whh1"], params["b1"])
        return (h1, c1, h2, c2), None

    (h1, c1, h2, c2), _ = lax.scan(scan_fn, (z, z, z, z),
                                   jnp.transpose(x, (1, 0, 2)))
    y = jnp.tanh(h2 @ params["wfc1"] + params["bfc1"])
    return jnp.tanh(y @ params["wfc2"] + params["bfc2"])


if __name__ == "__main__":
    batch, seq, input_size, hidden_size = 2, 8, 16, 32

    key = jax.random.PRNGKey(0)
    kx, kp = jax.random.split(key)
    x = jax.random.normal(kx, (batch, seq, input_size), jnp.float32)
    params = make_params(kp, input_size, hidden_size)

    # Weight prep done once, outside the hot path; the call path is jitted.
    prep = prepare_params(params)
    fwd = jax.jit(lstm_recovery_controller)

    out = jax.block_until_ready(fwd(x, prep))

    ref = reference_forward(x, params)
    assert out.shape == (batch, 1), out.shape
    assert jnp.allclose(out, ref, atol=1e-5, rtol=1e-5), (out, ref)

    print("KERNEL_OK")
</pallas_src>

<mosaic_0001>
module attributes {stable_mosaic.version = 11 : i64} {
  func.func @_lstm_ctrl_kernel(%arg0: memref<64x16xf32, #tpu.memory_space<vmem>>, %arg1: memref<112x128xf32, #tpu.memory_space<vmem>>, %arg2: memref<4x128xf32, #tpu.memory_space<vmem>>, %arg3: memref<33x16xf32, #tpu.memory_space<vmem>>, %arg4: memref<8x1xf32, #tpu.memory_space<vmem>>) attributes {dimension_semantics = [], scalar_prefetch = 0 : i64, scratch_operands = 0 : i64, tpu.core_type = #tpu.core_type<tc>} {
    %c0 = arith.constant 0 : index
    %c0_0 = arith.constant 0 : index
    %0 = vector.load %arg1[%c0, %c0_0] : memref<112x128xf32, #tpu.memory_space<vmem>>, vector<16x128xf32>
    %c16 = arith.constant 16 : index
    %c0_1 = arith.constant 0 : index
    %1 = vector.load %arg1[%c16, %c0_1] : memref<112x128xf32, #tpu.memory_space<vmem>>, vector<32x128xf32>
    %c48 = arith.constant 48 : index
    %c0_2 = arith.constant 0 : index
    %2 = vector.load %arg1[%c48, %c0_2] : memref<112x128xf32, #tpu.memory_space<vmem>>, vector<32x128xf32>
    %c80 = arith.constant 80 : index
    %c0_3 = arith.constant 0 : index
    %3 = vector.load %arg1[%c80, %c0_3] : memref<112x128xf32, #tpu.memory_space<vmem>>, vector<32x128xf32>
    %c0_4 = arith.constant 0 : index
    %c0_5 = arith.constant 0 : index
    %4 = vector.load %arg2[%c0_4, %c0_5] : memref<4x128xf32, #tpu.memory_space<vmem>>, vector<1x128xf32>
    %c1 = arith.constant 1 : index
    %c0_6 = arith.constant 0 : index
    %5 = vector.load %arg2[%c1, %c0_6] : memref<4x128xf32, #tpu.memory_space<vmem>>, vector<1x128xf32>
    %c2 = arith.constant 2 : index
    %c0_7 = arith.constant 0 : index
    %6 = vector.load %arg2[%c2, %c0_7] : memref<4x128xf32, #tpu.memory_space<vmem>>, vector<1x16xf32>
    %c3 = arith.constant 3 : index
    %c0_8 = arith.constant 0 : index
    %7 = vector.load %arg2[%c3, %c0_8] : memref<4x128xf32, #tpu.memory_space<vmem>>, vector<1x1xf32>
    %c0_9 = arith.constant 0 : index
    %c0_10 = arith.constant 0 : index
    %8 = vector.load %arg0[%c0_9, %c0_10] : memref<64x16xf32, #tpu.memory_space<vmem>>, vector<64x16xf32>
    %cst = arith.constant dense<0.000000e+00> : vector<64x128xf32>
    %9 = tpu.matmul %8, %0, %cst {dimension_numbers = #tpu.dot_dimension_numbers<[1], [0], [0], [1], [0, 0, 1, 1], [], []>} : vector<64x16xf32>, vector<16x128xf32>, vector<64x128xf32> -> vector<64x128xf32>
    %10 = vector.broadcast %4 : vector<1x128xf32> to vector<64x128xf32>
    %11 = arith.addf %9, %10 : vector<64x128xf32>
    %12 = vector.shape_cast %5 : vector<1x128xf32> to vector<1x128xf32>
    %13 = vector.broadcast %12 : vector<1x128xf32> to vector<8x128xf32>
    %cst_11 = arith.constant 0.000000e+00 : f32
    %14 = vector.broadcast %cst_11 : f32 to vector<8x32xf32>
    %cst_12 = arith.constant dense<0.000000e+00> : vector<8x128xf32>
    %15 = tpu.matmul %14, %3, %cst_12 {dimension_numbers = #tpu.dot_dimension_numbers<[1], [0], [0], [1], [0, 0, 1, 1], [], []>} : vector<8x32xf32>, vector<32x128xf32>, vector<8x128xf32> -> vector<8x128xf32>
    %16 = arith.addf %15, %13 : vector<8x128xf32>
    %17 = vector.extract_strided_slice %11 {offsets = [0, 0], sizes = [8, 128], strides = [1, 1]} : vector<64x128xf32> to vector<8x128xf32>
    %cst_13 = arith.constant dense<0.000000e+00> : vector<8x128xf32>
    %18 = tpu.matmul %14, %1, %cst_13 {dimension_numbers = #tpu.dot_dimension_numbers<[1], [0], [0], [1], [0, 0, 1, 1], [], []>} : vector<8x32xf32>, vector<32x128xf32>, vector<8x128xf32> -> vector<8x128xf32>
    %19 = arith.addf %17, %18 : vector<8x128xf32>
    %20 = vector.extract_strided_slice %19 {offsets = [0, 0], sizes = [8, 96], strides = [1, 1]} : vector<8x128xf32> to vector<8x96xf32>
    %21 = arith.negf %20 : vector<8x96xf32>
    %22 = math.exp %21 : vector<8x96xf32>
    %cst_14 = arith.constant 1.000000e+00 : f32
    %23 = vector.broadcast %cst_14 : f32 to vector<8x96xf32>
    %24 = arith.addf %23, %22 : vector<8x96xf32>
    %25 = arith.divf %23, %24 : vector<8x96xf32>
    %26 = vector.extract_strided_slice %25 {offsets = [0, 0], sizes = [8, 32], strides = [1, 1]} : vector<8x96xf32> to vector<8x32xf32>
    %27 = vector.extract_strided_slice %25 {offsets = [0, 32], sizes = [8, 32], strides = [1, 1]} : vector<8x96xf32> to vector<8x32xf32>
    %28 = vector.extract_strided_slice %25 {offsets = [0, 64], sizes = [8, 32], strides = [1, 1]} : vector<8x96xf32> to vector<8x32xf32>
    %29 = vector.extract_strided_slice %19 {offsets = [0, 96], sizes = [8, 32], strides = [1, 1]} : vector<8x128xf32> to vector<8x32xf32>
    %30 = math.tanh %29 : vector<8x32xf32>
    %31 = arith.mulf %27, %14 : vector<8x32xf32>
    %32 = arith.mulf %26, %30 : vector<8x32xf32>
    %33 = arith.addf %31, %32 : vector<8x32xf32>
    %34 = math.tanh %33 : vector<8x32xf32>
    %35 = arith.mulf %28, %34 : vector<8x32xf32>
    %cst_15 = arith.constant dense<0.000000e+00> : vector<8x128xf32>
    %36 = tpu.matmul %35, %2, %cst_15 {dimension_numbers = #tpu.dot_dimension_numbers<[1], [0], [0], [1], [0, 0, 1, 1], [], []>} : vector<8x32xf32>, vector<32x128xf32>, vector<8x128xf32> -> vector<8x128xf32>
    %37 = arith.addf %36, %16 : vector<8x128xf32>
    %38 = vector.extract_strided_slice %37 {offsets = [0, 0], sizes = [8, 96], strides = [1, 1]} : vector<8x128xf32> to vector<8x96xf32>
    %39 = arith.negf %38 : vector<8x96xf32>
    %40 = math.exp %39 : vector<8x96xf32>
    %cst_16 = arith.constant 1.000000e+00 : f32
    %41 = vector.broadcast %cst_16 : f32 to vector<8x96xf32>
    %42 = arith.addf %41, %40 : vector<8x96xf32>
    %43 = arith.divf %41, %42 : vector<8x96xf32>
    %44 = vector.extract_strided_slice %43 {offsets = [0, 0], sizes = [8, 32], strides = [1, 1]} : vector<8x96xf32> to vector<8x32xf32>
    %45 = vector.extract_strided_slice %43 {offsets = [0, 32], sizes = [8, 32], strides = [1, 1]} : vector<8x96xf32> to vector<8x32xf32>
    %46 = vector.extract_strided_slice %43 {offsets = [0, 64], sizes = [8, 32], strides = [1, 1]} : vector<8x96xf32> to vector<8x32xf32>
    %47 = vector.extract_strided_slice %37 {offsets = [0, 96], sizes = [8, 32], strides = [1, 1]} : vector<8x128xf32> to vector<8x32xf32>
    %48 = math.tanh %47 : vector<8x32xf32>
    %49 = arith.mulf %45, %14 : vector<8x32xf32>
    %50 = arith.mulf %44, %48 : vector<8x32xf32>
    %51 = arith.addf %49, %50 : vector<8x32xf32>
    %52 = math.tanh %51 : vector<8x32xf32>
    %53 = arith.mulf %46, %52 : vector<8x32xf32>
    %cst_17 = arith.constant dense<0.000000e+00> : vector<8x128xf32>
    %54 = tpu.matmul %53, %3, %cst_17 {dimension_numbers = #tpu.dot_dimension_numbers<[1], [0], [0], [1], [0, 0, 1, 1], [], []>} : vector<8x32xf32>, vector<32x128xf32>, vector<8x128xf32> -> vector<8x128xf32>
    %55 = arith.addf %54, %13 : vector<8x128xf32>
    %56 = vector.extract_strided_slice %11 {offsets = [8, 0], sizes = [8, 128], strides = [1, 1]} : vector<64x128xf32> to vector<8x128xf32>
    %cst_18 = arith.constant dense<0.000000e+00> : vector<8x128xf32>
    %57 = tpu.matmul %35, %1, %cst_18 {dimension_numbers = #tpu.dot_dimension_numbers<[1], [0], [0], [1], [0, 0, 1, 1], [], []>} : vector<8x32xf32>, vector<32x128xf32>, vector<8x128xf32> -> vector<8x128xf32>
    %58 = arith.addf %56, %57 : vector<8x128xf32>
    %59 = vector.extract_strided_slice %58 {offsets = [0, 0], sizes = [8, 96], strides = [1, 1]} : vector<8x128xf32> to vector<8x96xf32>
    %60 = arith.negf %59 : vector<8x96xf32>
    %61 = math.exp %60 : vector<8x96xf32>
    %cst_19 = arith.constant 1.000000e+00 : f32
    %62 = vector.broadcast %cst_19 : f32 to vector<8x96xf32>
    %63 = arith.addf %62, %61 : vector<8x96xf32>
    %64 = arith.divf %62, %63 : vector<8x96xf32>
    %65 = vector.extract_strided_slice %64 {offsets = [0, 0], sizes = [8, 32], strides = [1, 1]} : vector<8x96xf32> to vector<8x32xf32>
    %66 = vector.extract_strided_slice %64 {offsets = [0, 32], sizes = [8, 32], strides = [1, 1]} : vector<8x96xf32> to vector<8x32xf32>
    %67 = vector.extract_strided_slice %64 {offsets = [0, 64], sizes = [8, 32], strides = [1, 1]} : vector<8x96xf32> to vector<8x32xf32>
    %68 = vector.extract_strided_slice %58 {offsets = [0, 96], sizes = [8, 32], strides = [1, 1]} : vector<8x128xf32> to vector<8x32xf32>
    %69 = math.tanh %68 : vector<8x32xf32>
    %70 = arith.mulf %66, %33 : vector<8x32xf32>
    %71 = arith.mulf %65, %69 : vector<8x32xf32>
    %72 = arith.addf %70, %71 : vector<8x32xf32>
    %73 = math.tanh %72 : vector<8x32xf32>
    %74 = arith.mulf %67, %73 : vector<8x32xf32>
    %cst_20 = arith.constant dense<0.000000e+00> : vector<8x128xf32>
    %75 = tpu.matmul %74, %2, %cst_20 {dimension_numbers = #tpu.dot_dimension_numbers<[1], [0], [0], [1], [0, 0, 1, 1], [], []>} : vector<8x32xf32>, vector<32x128xf32>, vector<8x128xf32> -> vector<8x128xf32>
    %76 = arith.addf %75, %55 : vector<8x128xf32>
    %77 = vector.extract_strided_slice %76 {offsets = [0, 0], sizes = [8, 96], strides = [1, 1]} : vector<8x128xf32> to vector<8x96xf32>
    %78 = arith.negf %77 : vector<8x96xf32>
    %79 = math.exp %78 : vector<8x96xf32>
    %cst_21 = arith.constant 1.000000e+00 : f32
    %80 = vector.broadcast %cst_21 : f32 to vector<8x96xf32>
    %81 = arith.addf %80, %79 : vector<8x96xf32>
    %82 = arith.divf %80, %81 : vector<8x96xf32>
    %83 = vector.extract_strided_slice %82 {offsets = [0, 0], sizes = [8, 32], strides = [1, 1]} : vector<8x96xf32> to vector<8x32xf32>
    %84 = vector.extract_strided_slice %82 {offsets = [0, 32], sizes = [8, 32], strides = [1, 1]} : vector<8x96xf32> to vector<8x32xf32>
    %85 = vector.extract_strided_slice %82 {offsets = [0, 64], sizes = [8, 32], strides = [1, 1]} : vector<8x96xf32> to vector<8x32xf32>
    %86 = vector.extract_strided_slice %76 {offsets = [0, 96], sizes = [8, 32], strides = [1, 1]} : vector<8x128xf32> to vector<8x32xf32>
    %87 = math.tanh %86 : vector<8x32xf32>
    %88 = arith.mulf %84, %51 : vector<8x32xf32>
    %89 = arith.mulf %83, %87 : vector<8x32xf32>
    %90 = arith.addf %88, %89 : vector<8x32xf32>
    %91 = math.tanh %90 : vector<8x32xf32>
    %92 = arith.mulf %85, %91 : vector<8x32xf32>
    %cst_22 = arith.constant dense<0.000000e+00> : vector<8x128xf32>
    %93 = tpu.matmul %92, %3, %cst_22 {dimension_numbers = #tpu.dot_dimension_numbers<[1], [0], [0], [1], [0, 0, 1, 1], [], []>} : vector<8x32xf32>, vector<32x128xf32>, vector<8x128xf32> -> vector<8x128xf32>
    %94 = arith.addf %93, %13 : vector<8x128xf32>
    %95 = vector.extract_strided_slice %11 {offsets = [16, 0], sizes = [8, 128], strides = [1, 1]} : vector<64x128xf32> to vector<8x128xf32>
    %cst_23 = arith.constant dense<0.000000e+00> : vector<8x128xf32>
    %96 = tpu.matmul %74, %1, %cst_23 {dimension_numbers = #tpu.dot_dimension_numbers<[1], [0], [0], [1], [0, 0, 1, 1], [], []>} : vector<8x32xf32>, vector<32x128xf32>, vector<8x128xf32> -> vector<8x128xf32>
    %97 = arith.addf %95, %96 : vector<8x128xf32>
    %98 = vector.extract_strided_slice %97 {offsets = [0, 0], sizes = [8, 96], strides = [1, 1]} : vector<8x128xf32> to vector<8x96xf32>
    %99 = arith.negf %98 : vector<8x96xf32>
    %100 = math.exp %99 : vector<8x96xf32>
    %cst_24 = arith.constant 1.000000e+00 : f32
    %101 = vector.broadcast %cst_24 : f32 to vector<8x96xf32>
    %102 = arith.addf %101, %100 : vector<8x96xf32>
    %103 = arith.divf %101, %102 : vector<8x96xf32>
    %104 = vector.extract_strided_slice %103 {offsets = [0, 0], sizes = [8, 32], strides = [1, 1]} : vector<8x96xf32> to vector<8x32xf32>
    %105 = vector.extract_strided_slice %103 {offsets = [0, 32], sizes = [8, 32], strides = [1, 1]} : vector<8x96xf32> to vector<8x32xf32>
    %106 = vector.extract_strided_slice %103 {offsets = [0, 64], sizes = [8, 32], strides = [1, 1]} : vector<8x96xf32> to vector<8x32xf32>
    %107 = vector.extract_strided_slice %97 {offsets = [0, 96], sizes = [8, 32], strides = [1, 1]} : vector<8x128xf32> to vector<8x32xf32>
    %108 = math.tanh %107 : vector<8x32xf32>
    %109 = arith.mulf %105, %72 : vector<8x32xf32>
    %110 = arith.mulf %104, %108 : vector<8x32xf32>
    %111 = arith.addf %109, %110 : vector<8x32xf32>
    %112 = math.tanh %111 : vector<8x32xf32>
    %113 = arith.mulf %106, %112 : vector<8x32xf32>
    %cst_25 = arith.constant dense<0.000000e+00> : vector<8x128xf32>
    %114 = tpu.matmul %113, %2, %cst_25 {dimension_numbers = #tpu.dot_dimension_numbers<[1], [0], [0], [1], [0, 0, 1, 1], [], []>} : vector<8x32xf32>, vector<32x128xf32>, vector<8x128xf32> -> vector<8x128xf32>
    %115 = arith.addf %114, %94 : vector<8x128xf32>
    %116 = vector.extract_strided_slice %115 {offsets = [0, 0], sizes = [8, 96], strides = [1, 1]} : vector<8x128xf32> to vector<8x96xf32>
    %117 = arith.negf %116 : vector<8x96xf32>
    %118 = math.exp %117 : vector<8x96xf32>
    %cst_26 = arith.constant 1.000000e+00 : f32
    %119 = vector.broadcast %cst_26 : f32 to vector<8x96xf32>
    %120 = arith.addf %119, %118 : vector<8x96xf32>
    %121 = arith.divf %119, %120 : vector<8x96xf32>
    %122 = vector.extract_strided_slice %121 {offsets = [0, 0], sizes = [8, 32], strides = [1, 1]} : vector<8x96xf32> to vector<8x32xf32>
    %123 = vector.extract_strided_slice %121 {offsets = [0, 32], sizes = [8, 32], strides = [1, 1]} : vector<8x96xf32> to vector<8x32xf32>
    %124 = vector.extract_strided_slice %121 {offsets = [0, 64], sizes = [8, 32], strides = [1, 1]} : vector<8x96xf32> to vector<8x32xf32>
    %125 = vector.extract_strided_slice %115 {offsets = [0, 96], sizes = [8, 32], strides = [1, 1]} : vector<8x128xf32> to vector<8x32xf32>
    %126 = math.tanh %125 : vector<8x32xf32>
    %127 = arith.mulf %123, %90 : vector<8x32xf32>
    %128 = arith.mulf %122, %126 : vector<8x32xf32>
    %129 = arith.addf %127, %128 : vector<8x32xf32>
    %130 = math.tanh %129 : vector<8x32xf32>
    %131 = arith.mulf %124, %130 : vector<8x32xf32>
    %cst_27 = arith.constant dense<0.000000e+00> : vector<8x128xf32>
    %132 = tpu.matmul %131, %3, %cst_27 {dimension_numbers = #tpu.dot_dimension_numbers<[1], [0], [0], [1], [0, 0, 1, 1], [], []>} : vector<8x32xf32>, vector<32x128xf32>, vector<8x128xf32> -> vector<8x128xf32>
    %133 = arith.addf %132, %13 : vector<8x128xf32>
    %134 = vector.extract_strided_slice %11 {offsets = [24, 0], sizes = [8, 128], strides = [1, 1]} : vector<64x128xf32> to vector<8x128xf32>
    %cst_28 = arith.constant dense<0.000000e+00> : vector<8x128xf32>
    %135 = tpu.matmul %113, %1, %cst_28 {dimension_numbers = #tpu.dot_dimension_numbers<[1], [0], [0], [1], [0, 0, 1, 1], [], []>} : vector<8x32xf32>, vector<32x128xf32>, vector<8x128xf32> -> vector<8x128xf32>
    %136 = arith.addf %134, %135 : vector<8x128xf32>
    %137 = vector.extract_strided_slice %136 {offsets = [0, 0], sizes = [8, 96], strides = [1, 1]} : vector<8x128xf32> to vector<8x96xf32>
    %138 = arith.negf %137 : vector<8x96xf32>
    %139 = math.exp %138 : vector<8x96xf32>
    %cst_29 = arith.constant 1.000000e+00 : f32
    %140 = vector.broadcast %cst_29 : f32 to vector<8x96xf32>
    %141 = arith.addf %140, %139 : vector<8x96xf32>
    %142 = arith.divf %140, %141 : vector<8x96xf32>
    %143 = vector.extract_strided_slice %142 {offsets = [0, 0], sizes = [8, 32], strides = [1, 1]} : vector<8x96xf32> to vector<8x32xf32>
    %144 = vector.extract_strided_slice %142 {offsets = [0, 32], sizes = [8, 32], strides = [1, 1]} : vector<8x96xf32> to vector<8x32xf32>
    %145 = vector.extract_strided_slice %142 {offsets = [0, 64], sizes = [8, 32], strides = [1, 1]} : vector<8x96xf32> to vector<8x32xf32>
    %146 = vector.extract_strided_slice %136 {offsets = [0, 96], sizes = [8, 32], strides = [1, 1]} : vector<8x128xf32> to vector<8x32xf32>
    %147 = math.tanh %146 : vector<8x32xf32>
    %148 = arith.mulf %144, %111 : vector<8x32xf32>
    %149 = arith.mulf %143, %147 : vector<8x32xf32>
    %150 = arith.addf %148, %149 : vector<8x32xf32>
    %151 = math.tanh %150 : vector<8x32xf32>
    %152 = arith.mulf %145, %151 : vector<8x32xf32>
    %cst_30 = arith.constant dense<0.000000e+00> : vector<8x128xf32>
    %153 = tpu.matmul %152, %2, %cst_30 {dimension_numbers = #tpu.dot_dimension_numbers<[1], [0], [0], [1], [0, 0, 1, 1], [], []>} : vector<8x32xf32>, vector<32x128xf32>, vector<8x128xf32> -> vector<8x128xf32>
    %154 = arith.addf %153, %133 : vector<8x128xf32>
    %155 = vector.extract_strided_slice %154 {offsets = [0, 0], sizes = [8, 96], strides = [1, 1]} : vector<8x128xf32> to vector<8x96xf32>
    %156 = arith.negf %155 : vector<8x96xf32>
    %157 = math.exp %156 : vector<8x96xf32>
    %cst_31 = arith.constant 1.000000e+00 : f32
    %158 = vector.broadcast %cst_31 : f32 to vector<8x96xf32>
    %159 = arith.addf %158, %157 : vector<8x96xf32>
    %160 = arith.divf %158, %159 : vector<8x96xf32>
    %161 = vector.extract_strided_slice %160 {offsets = [0, 0], sizes = [8, 32], strides = [1, 1]} : vector<8x96xf32> to vector<8x32xf32>
    %162 = vector.extract_strided_slice %160 {offsets = [0, 32], sizes = [8, 32], strides = [1, 1]} : vector<8x96xf32> to vector<8x32xf32>
    %163 = vector.extract_strided_slice %160 {offsets = [0, 64], sizes = [8, 32], strides = [1, 1]} : vector<8x96xf32> to vector<8x32xf32>
    %164 = vector.extract_strided_slice %154 {offsets = [0, 96], sizes = [8, 32], strides = [1, 1]} : vector<8x128xf32> to vector<8x32xf32>
    %165 = math.tanh %164 : vector<8x32xf32>
    %166 = arith.mulf %162, %129 : vector<8x32xf32>
    %167 = arith.mulf %161, %165 : vector<8x32xf32>
    %168 = arith.addf %166, %167 : vector<8x32xf32>
    %169 = math.tanh %168 : vector<8x32xf32>
    %170 = arith.mulf %163, %169 : vector<8x32xf32>
    %cst_32 = arith.constant dense<0.000000e+00> : vector<8x128xf32>
    %171 = tpu.matmul %170, %3, %cst_32 {dimension_numbers = #tpu.dot_dimension_numbers<[1], [0], [0], [1], [0, 0, 1, 1], [], []>} : vector<8x32xf32>, vector<32x128xf32>, vector<8x128xf32> -> vector<8x128xf32>
    %172 = arith.addf %171, %13 : vector<8x128xf32>
    %173 = vector.extract_strided_slice %11 {offsets = [32, 0], sizes = [8, 128], strides = [1, 1]} : vector<64x128xf32> to vector<8x128xf32>
    %cst_33 = arith.constant dense<0.000000e+00> : vector<8x128xf32>
    %174 = tpu.matmul %152, %1, %cst_33 {dimension_numbers = #tpu.dot_dimension_numbers<[1], [0], [0], [1], [0, 0, 1, 1], [], []>} : vector<8x32xf32>, vector<32x128xf32>, vector<8x128xf32> -> vector<8x128xf32>
    %175 = arith.addf %173, %174 : vector<8x128xf32>
    %176 = vector.extract_strided_slice %175 {offsets = [0, 0], sizes = [8, 96], strides = [1, 1]} : vector<8x128xf32> to vector<8x96xf32>
    %177 = arith.negf %176 : vector<8x96xf32>
    %178 = math.exp %177 : vector<8x96xf32>
    %cst_34 = arith.constant 1.000000e+00 : f32
    %179 = vector.broadcast %cst_34 : f32 to vector<8x96xf32>
    %180 = arith.addf %179, %178 : vector<8x96xf32>
    %181 = arith.divf %179, %180 : vector<8x96xf32>
    %182 = vector.extract_strided_slice %181 {offsets = [0, 0], sizes = [8, 32], strides = [1, 1]} : vector<8x96xf32> to vector<8x32xf32>
    %183 = vector.extract_strided_slice %181 {offsets = [0, 32], sizes = [8, 32], strides = [1, 1]} : vector<8x96xf32> to vector<8x32xf32>
    %184 = vector.extract_strided_slice %181 {offsets = [0, 64], sizes = [8, 32], strides = [1, 1]} : vector<8x96xf32> to vector<8x32xf32>
    %185 = vector.extract_strided_slice %175 {offsets = [0, 96], sizes = [8, 32], strides = [1, 1]} : vector<8x128xf32> to vector<8x32xf32>
    %186 = math.tanh %185 : vector<8x32xf32>
    %187 = arith.mulf %183, %150 : vector<8x32xf32>
    %188 = arith.mulf %182, %186 : vector<8x32xf32>
    %189 = arith.addf %187, %188 : vector<8x32xf32>
    %190 = math.tanh %189 : vector<8x32xf32>
    %191 = arith.mulf %184, %190 : vector<8x32xf32>
    %cst_35 = arith.constant dense<0.000000e+00> : vector<8x128xf32>
    %192 = tpu.matmul %191, %2, %cst_35 {dimension_numbers = #tpu.dot_dimension_numbers<[1], [0], [0], [1], [0, 0, 1, 1], [], []>} : vector<8x32xf32>, vector<32x128xf32>, vector<8x128xf32> -> vector<8x128xf32>
    %193 = arith.addf %192, %172 : vector<8x128xf32>
    %194 = vector.extract_strided_slice %193 {offsets = [0, 0], sizes = [8, 96], strides = [1, 1]} : vector<8x128xf32> to vector<8x96xf32>
    %195 = arith.negf %194 : vector<8x96xf32>
    %196 = math.exp %195 : vector<8x96xf32>
    %cst_36 = arith.constant 1.000000e+00 : f32
    %197 = vector.broadcast %cst_36 : f32 to vector<8x96xf32>
    %198 = arith.addf %197, %196 : vector<8x96xf32>
    %199 = arith.divf %197, %198 : vector<8x96xf32>
    %200 = vector.extract_strided_slice %199 {offsets = [0, 0], sizes = [8, 32], strides = [1, 1]} : vector<8x96xf32> to vector<8x32xf32>
    %201 = vector.extract_strided_slice %199 {offsets = [0, 32], sizes = [8, 32], strides = [1, 1]} : vector<8x96xf32> to vector<8x32xf32>
    %202 = vector.extract_strided_slice %199 {offsets = [0, 64], sizes = [8, 32], strides = [1, 1]} : vector<8x96xf32> to vector<8x32xf32>
    %203 = vector.extract_strided_slice %193 {offsets = [0, 96], sizes = [8, 32], strides = [1, 1]} : vector<8x128xf32> to vector<8x32xf32>
    %204 = math.tanh %203 : vector<8x32xf32>
    %205 = arith.mulf %201, %168 : vector<8x32xf32>
    %206 = arith.mulf %200, %204 : vector<8x32xf32>
    %207 = arith.addf %205, %206 : vector<8x32xf32>
    %208 = math.tanh %207 : vector<8x32xf32>
    %209 = arith.mulf %202, %208 : vector<8x32xf32>
    %cst_37 = arith.constant dense<0.000000e+00> : vector<8x128xf32>
    %210 = tpu.matmul %209, %3, %cst_37 {dimension_numbers = #tpu.dot_dimension_numbers<[1], [0], [0], [1], [0, 0, 1, 1], [], []>} : vector<8x32xf32>, vector<32x128xf32>, vector<8x128xf32> -> vector<8x128xf32>
    %211 = arith.addf %210, %13 : vector<8x128xf32>
    %212 = vector.extract_strided_slice %11 {offsets = [40, 0], sizes = [8, 128], strides = [1, 1]} : vector<64x128xf32> to vector<8x128xf32>
    %cst_38 = arith.constant dense<0.000000e+00> : vector<8x128xf32>
    %213 = tpu.matmul %191, %1, %cst_38 {dimension_numbers = #tpu.dot_dimension_numbers<[1], [0], [0], [1], [0, 0, 1, 1], [], []>} : vector<8x32xf32>, vector<32x128xf32>, vector<8x128xf32> -> vector<8x128xf32>
    %214 = arith.addf %212, %213 : vector<8x128xf32>
    %215 = vector.extract_strided_slice %214 {offsets = [0, 0], sizes = [8, 96], strides = [1, 1]} : vector<8x128xf32> to vector<8x96xf32>
    %216 = arith.negf %215 : vector<8x96xf32>
    %217 = math.exp %216 : vector<8x96xf32>
    %cst_39 = arith.constant 1.000000e+00 : f32
    %218 = vector.broadcast %cst_39 : f32 to vector<8x96xf32>
    %219 = arith.addf %218, %217 : vector<8x96xf32>
    %220 = arith.divf %218, %219 : vector<8x96xf32>
    %221 = vector.extract_strided_slice %220 {offsets = [0, 0], sizes = [8, 32], strides = [1, 1]} : vector<8x96xf32> to vector<8x32xf32>
    %222 = vector.extract_strided_slice %220 {offsets = [0, 32], sizes = [8, 32], strides = [1, 1]} : vector<8x96xf32> to vector<8x32xf32>
    %223 = vector.extract_strided_slice %220 {offsets = [0, 64], sizes = [8, 32], strides = [1, 1]} : vector<8x96xf32> to vector<8x32xf32>
    %224 = vector.extract_strided_slice %214 {offsets = [0, 96], sizes = [8, 32], strides = [1, 1]} : vector<8x128xf32> to vector<8x32xf32>
    %225 = math.tanh %224 : vector<8x32xf32>
    %226 = arith.mulf %222, %189 : vector<8x32xf32>
    %227 = arith.mulf %221, %225 : vector<8x32xf32>
    %228 = arith.addf %226, %227 : vector<8x32xf32>
    %229 = math.tanh %228 : vector<8x32xf32>
    %230 = arith.mulf %223, %229 : vector<8x32xf32>
    %cst_40 = arith.constant dense<0.000000e+00> : vector<8x128xf32>
    %231 = tpu.matmul %230, %2, %cst_40 {dimension_numbers = #tpu.dot_dimension_numbers<[1], [0], [0], [1], [0, 0, 1, 1], [], []>} : vector<8x32xf32>, vector<32x128xf32>, vector<8x128xf32> -> vector<8x128xf32>
    %232 = arith.addf %231, %211 : vector<8x128xf32>
    %233 = vector.extract_strided_slice %232 {offsets = [0, 0], sizes = [8, 96], strides = [1, 1]} : vector<8x128xf32> to vector<8x96xf32>
    %234 = arith.negf %233 : vector<8x96xf32>
    %235 = math.exp %234 : vector<8x96xf32>
    %cst_41 = arith.constant 1.000000e+00 : f32
    %236 = vector.broadcast %cst_41 : f32 to vector<8x96xf32>
    %237 = arith.addf %236, %235 : vector<8x96xf32>
    %238 = arith.divf %236, %237 : vector<8x96xf32>
    %239 = vector.extract_strided_slice %238 {offsets = [0, 0], sizes = [8, 32], strides = [1, 1]} : vector<8x96xf32> to vector<8x32xf32>
    %240 = vector.extract_strided_slice %238 {offsets = [0, 32], sizes = [8, 32], strides = [1, 1]} : vector<8x96xf32> to vector<8x32xf32>
    %241 = vector.extract_strided_slice %238 {offsets = [0, 64], sizes = [8, 32], strides = [1, 1]} : vector<8x96xf32> to vector<8x32xf32>
    %242 = vector.extract_strided_slice %232 {offsets = [0, 96], sizes = [8, 32], strides = [1, 1]} : vector<8x128xf32> to vector<8x32xf32>
    %243 = math.tanh %242 : vector<8x32xf32>
    %244 = arith.mulf %240, %207 : vector<8x32xf32>
    %245 = arith.mulf %239, %243 : vector<8x32xf32>
    %246 = arith.addf %244, %245 : vector<8x32xf32>
    %247 = math.tanh %246 : vector<8x32xf32>
    %248 = arith.mulf %241, %247 : vector<8x32xf32>
    %cst_42 = arith.constant dense<0.000000e+00> : vector<8x128xf32>
    %249 = tpu.matmul %248, %3, %cst_42 {dimension_numbers = #tpu.dot_dimension_numbers<[1], [0], [0], [1], [0, 0, 1, 1], [], []>} : vector<8x32xf32>, vector<32x128xf32>, vector<8x128xf32> -> vector<8x128xf32>
    %250 = arith.addf %249, %13 : vector<8x128xf32>
    %251 = vector.extract_strided_slice %11 {offsets = [48, 0], sizes = [8, 128], strides = [1, 1]} : vector<64x128xf32> to vector<8x128xf32>
    %cst_43 = arith.constant dense<0.000000e+00> : vector<8x128xf32>
    %252 = tpu.matmul %230, %1, %cst_43 {dimension_numbers = #tpu.dot_dimension_numbers<[1], [0], [0], [1], [0, 0, 1, 1], [], []>} : vector<8x32xf32>, vector<32x128xf32>, vector<8x128xf32> -> vector<8x128xf32>
    %253 = arith.addf %251, %252 : vector<8x128xf32>
    %254 = vector.extract_strided_slice %253 {offsets = [0, 0], sizes = [8, 96], strides = [1, 1]} : vector<8x128xf32> to vector<8x96xf32>
    %255 = arith.negf %254 : vector<8x96xf32>
    %256 = math.exp %255 : vector<8x96xf32>
    %cst_44 = arith.constant 1.000000e+00 : f32
    %257 = vector.broadcast %cst_44 : f32 to vector<8x96xf32>
    %258 = arith.addf %257, %256 : vector<8x96xf32>
    %259 = arith.divf %257, %258 : vector<8x96xf32>
    %260 = vector.extract_strided_slice %259 {offsets = [0, 0], sizes = [8, 32], strides = [1, 1]} : vector<8x96xf32> to vector<8x32xf32>
    %261 = vector.extract_strided_slice %259 {offsets = [0, 32], sizes = [8, 32], strides = [1, 1]} : vector<8x96xf32> to vector<8x32xf32>
    %262 = vector.extract_strided_slice %259 {offsets = [0, 64], sizes = [8, 32], strides = [1, 1]} : vector<8x96xf32> to vector<8x32xf32>
    %263 = vector.extract_strided_slice %253 {offsets = [0, 96], sizes = [8, 32], strides = [1, 1]} : vector<8x128xf32> to vector<8x32xf32>
    %264 = math.tanh %263 : vector<8x32xf32>
    %265 = arith.mulf %261, %228 : vector<8x32xf32>
    %266 = arith.mulf %260, %264 : vector<8x32xf32>
    %267 = arith.addf %265, %266 : vector<8x32xf32>
    %268 = math.tanh %267 : vector<8x32xf32>
    %269 = arith.mulf %262, %268 : vector<8x32xf32>
    %cst_45 = arith.constant dense<0.000000e+00> : vector<8x128xf32>
    %270 = tpu.matmul %269, %2, %cst_45 {dimension_numbers = #tpu.dot_dimension_numbers<[1], [0], [0], [1], [0, 0, 1, 1], [], []>} : vector<8x32xf32>, vector<32x128xf32>, vector<8x128xf32> -> vector<8x128xf32>
    %271 = arith.addf %270, %250 : vector<8x128xf32>
    %272 = vector.extract_strided_slice %271 {offsets = [0, 0], sizes = [8, 96], strides = [1, 1]} : vector<8x128xf32> to vector<8x96xf32>
    %273 = arith.negf %272 : vector<8x96xf32>
    %274 = math.exp %273 : vector<8x96xf32>
    %cst_46 = arith.constant 1.000000e+00 : f32
    %275 = vector.broadcast %cst_46 : f32 to vector<8x96xf32>
    %276 = arith.addf %275, %274 : vector<8x96xf32>
    %277 = arith.divf %275, %276 : vector<8x96xf32>
    %278 = vector.extract_strided_slice %277 {offsets = [0, 0], sizes = [8, 32], strides = [1, 1]} : vector<8x96xf32> to vector<8x32xf32>
    %279 = vector.extract_strided_slice %277 {offsets = [0, 32], sizes = [8, 32], strides = [1, 1]} : vector<8x96xf32> to vector<8x32xf32>
    %280 = vector.extract_strided_slice %277 {offsets = [0, 64], sizes = [8, 32], strides = [1, 1]} : vector<8x96xf32> to vector<8x32xf32>
    %281 = vector.extract_strided_slice %271 {offsets = [0, 96], sizes = [8, 32], strides = [1, 1]} : vector<8x128xf32> to vector<8x32xf32>
    %282 = math.tanh %281 : vector<8x32xf32>
    %283 = arith.mulf %279, %246 : vector<8x32xf32>
    %284 = arith.mulf %278, %282 : vector<8x32xf32>
    %285 = arith.addf %283, %284 : vector<8x32xf32>
    %286 = math.tanh %285 : vector<8x32xf32>
    %287 = arith.mulf %280, %286 : vector<8x32xf32>
    %cst_47 = arith.constant dense<0.000000e+00> : vector<8x128xf32>
    %288 = tpu.matmul %287, %3, %cst_47 {dimension_numbers = #tpu.dot_dimension_numbers<[1], [0], [0], [1], [0, 0, 1, 1], [], []>} : vector<8x32xf32>, vector<32x128xf32>, vector<8x128xf32> -> vector<8x128xf32>
    %289 = arith.addf %288, %13 : vector<8x128xf32>
    %290 = vector.extract_strided_slice %11 {offsets = [56, 0], sizes = [8, 128], strides = [1, 1]} : vector<64x128xf32> to vector<8x128xf32>
    %cst_48 = arith.constant dense<0.000000e+00> : vector<8x128xf32>
    %291 = tpu.matmul %269, %1, %cst_48 {dimension_numbers = #tpu.dot_dimension_numbers<[1], [0], [0], [1], [0, 0, 1, 1], [], []>} : vector<8x32xf32>, vector<32x128xf32>, vector<8x128xf32> -> vector<8x128xf32>
    %292 = arith.addf %290, %291 : vector<8x128xf32>
    %293 = vector.extract_strided_slice %292 {offsets = [0, 0], sizes = [8, 96], strides = [1, 1]} : vector<8x128xf32> to vector<8x96xf32>
    %294 = arith.negf %293 : vector<8x96xf32>
    %295 = math.exp %294 : vector<8x96xf32>
    %cst_49 = arith.constant 1.000000e+00 : f32
    %296 = vector.broadcast %cst_49 : f32 to vector<8x96xf32>
    %297 = arith.addf %296, %295 : vector<8x96xf32>
    %298 = arith.divf %296, %297 : vector<8x96xf32>
    %299 = vector.extract_strided_slice %298 {offsets = [0, 0], sizes = [8, 32], strides = [1, 1]} : vector<8x96xf32> to vector<8x32xf32>
    %300 = vector.extract_strided_slice %298 {offsets = [0, 32], sizes = [8, 32], strides = [1, 1]} : vector<8x96xf32> to vector<8x32xf32>
    %301 = vector.extract_strided_slice %298 {offsets = [0, 64], sizes = [8, 32], strides = [1, 1]} : vector<8x96xf32> to vector<8x32xf32>
    %302 = vector.extract_strided_slice %292 {offsets = [0, 96], sizes = [8, 32], strides = [1, 1]} : vector<8x128xf32> to vector<8x32xf32>
    %303 = math.tanh %302 : vector<8x32xf32>
    %304 = arith.mulf %300, %267 : vector<8x32xf32>
    %305 = arith.mulf %299, %303 : vector<8x32xf32>
    %306 = arith.addf %304, %305 : vector<8x32xf32>
    %307 = math.tanh %306 : vector<8x32xf32>
    %308 = arith.mulf %301, %307 : vector<8x32xf32>
    %cst_50 = arith.constant dense<0.000000e+00> : vector<8x128xf32>
    %309 = tpu.matmul %308, %2, %cst_50 {dimension_numbers = #tpu.dot_dimension_numbers<[1], [0], [0], [1], [0, 0, 1, 1], [], []>} : vector<8x32xf32>, vector<32x128xf32>, vector<8x128xf32> -> vector<8x128xf32>
    %310 = arith.addf %309, %289 : vector<8x128xf32>
    %311 = vector.extract_strided_slice %310 {offsets = [0, 0], sizes = [8, 96], strides = [1, 1]} : vector<8x128xf32> to vector<8x96xf32>
    %312 = arith.negf %311 : vector<8x96xf32>
    %313 = math.exp %312 : vector<8x96xf32>
    %cst_51 = arith.constant 1.000000e+00 : f32
    %314 = vector.broadcast %cst_51 : f32 to vector<8x96xf32>
    %315 = arith.addf %314, %313 : vector<8x96xf32>
    %316 = arith.divf %314, %315 : vector<8x96xf32>
    %317 = vector.extract_strided_slice %316 {offsets = [0, 0], sizes = [8, 32], strides = [1, 1]} : vector<8x96xf32> to vector<8x32xf32>
    %318 = vector.extract_strided_slice %316 {offsets = [0, 32], sizes = [8, 32], strides = [1, 1]} : vector<8x96xf32> to vector<8x32xf32>
    %319 = vector.extract_strided_slice %316 {offsets = [0, 64], sizes = [8, 32], strides = [1, 1]} : vector<8x96xf32> to vector<8x32xf32>
    %320 = vector.extract_strided_slice %310 {offsets = [0, 96], sizes = [8, 32], strides = [1, 1]} : vector<8x128xf32> to vector<8x32xf32>
    %321 = math.tanh %320 : vector<8x32xf32>
    %322 = arith.mulf %318, %285 : vector<8x32xf32>
    %323 = arith.mulf %317, %321 : vector<8x32xf32>
    %324 = arith.addf %322, %323 : vector<8x32xf32>
    %325 = math.tanh %324 : vector<8x32xf32>
    %326 = arith.mulf %319, %325 : vector<8x32xf32>
    %c0_52 = arith.constant 0 : index
    %c0_53 = arith.constant 0 : index
    %327 = vector.load %arg3[%c0_52, %c0_53] : memref<33x16xf32, #tpu.memory_space<vmem>>, vector<32x16xf32>
    %c32 = arith.constant 32 : index
    %c0_54 = arith.constant 0 : index
    %328 = vector.load %arg3[%c32, %c0_54] : memref<33x16xf32, #tpu.memory_space<vmem>>, vector<1x16xf32>
    %cst_55 = arith.constant dense<0.000000e+00> : vector<8x16xf32>
    %329 = tpu.matmul %326, %327, %cst_55 {dimension_numbers = #tpu.dot_dimension_numbers<[1], [0], [0], [1], [0, 0, 1, 1], [], []>} : vector<8x32xf32>, vector<32x16xf32>, vector<8x16xf32> -> vector<8x16xf32>
    %330 = vector.broadcast %6 : vector<1x16xf32> to vector<8x16xf32>
    %331 = arith.addf %329, %330 : vector<8x16xf32>
    %332 = math.tanh %331 : vector<8x16xf32>
    %333 = vector.broadcast %328 : vector<1x16xf32> to vector<8x16xf32>
    %334 = arith.mulf %332, %333 : vector<8x16xf32>
    %cst_56 = arith.constant dense<0.000000e+00> : vector<8xf32>
    %335 = vector.multi_reduction <add>, %334, %cst_56 [1] : vector<8x16xf32> to vector<8xf32>
    %336 = vector.shape_cast %335 : vector<8xf32> to vector<8x1xf32>
    %337 = vector.broadcast %7 : vector<1x1xf32> to vector<8x1xf32>
    %338 = arith.addf %336, %337 : vector<8x1xf32>
    %339 = math.tanh %338 : vector<8x1xf32>
    %c0_57 = arith.constant 0 : index
    %c0_58 = arith.constant 0 : index
    %340 = vector.load %arg4[%c0_57, %c0_58] : memref<8x1xf32, #tpu.memory_space<vmem>>, vector<8x1xf32>
    tpu.vector_store %arg4[%c0_57, %c0_58], %339 {strides = array<i32>} : memref<8x1xf32, #tpu.memory_space<vmem>>, vector<8x1xf32>,
    return
  }
}

</mosaic_0001>

<bundles_post_ra>
// kernel: lstm_recovery_controller.1
= control target key start
LH: loop header
LB: loop body
LE: loop exit
PB: predicated region body
PF: predicated region fallthrough
CT: control target
= control target key end

     0   :  { %v3231_v0 = vmov 0.0|0.0   ;;  %vm3232_vm0 = vmmov 0   ;;  %v3233_v4 = vmov 0.0   ;;  %vm47_vm1 = vcmask 130048   ;;  %s3234_s15 = smov 32   ;;  %s3235_s24 = smov 64   ;;  %s3710_s1 = inlined_call_operand.vmem [shape: f32[112,128], index: 1, kind: input, shape index: {}]   ;;  %s3711_s0 = inlined_call_operand.vmem [shape: f32[64,16], index: 0, kind: input, shape index: {}]   ;;  %s3712_s2 = inlined_call_operand.vmem [shape: f32[4,128], index: 2, kind: input, shape index: {}]   ;;  %s3713_s3 = inlined_call_operand.vmem [shape: f32[33,16], index: 3, kind: input, shape index: {}]   ;;  %s3714_s4 = inlined_call_operand.vmem [shape: f32[8,1], index: 4, kind: output, shape index: {}]  }
   0x1   :  { %2919 = vmatprep.subr.bf16.mxu1 %v3231_v0  ;;  %v27_v1 = vld [vmem:[%s3710_s1 + $0x50] sm:$0xff]  ;;  %v28_v2 = vld [vmem:[%s3710_s1 + $0x58] sm:$0xff]  ;;  %v29_v3 = vld [vmem:[%s3710_s1 + $0x60] sm:$0xff]  ;;  %2648 = vmatprep.mubr.msk.f32.mxu1 %vm3232_vm0, %v3233_v4  ;;  %vm181_vm2 = vcmask 261120   ;;  %vm2431_vm3 = vcmask 7168  }
   0x2   :  { %v3273_v5 = vpack.c.bf16 %v28_v2, %v27_v1  ;;  %v30_v6 = vld [vmem:[%s3710_s1 + $0x68] sm:$0xff]  ;;  %v17_v7 = vld [vmem:[%s3710_s1] sm:$0xff]  ;;  %v19_v12 = vld [vmem:[%s3710_s1 + $0x10] sm:$0xff] }
   0x3   :  { %v18_v8 = vld [vmem:[%s3710_s1 + $0x8] sm:$0xff]  ;;  %v35_v10 = vld [vmem:[%s3711_s0] sm:$0xff]  ;;  %v3288_v11 = vpack.c.bf16 %v30_v6, %v29_v3  ;;  %v20_v13 = vld [vmem:[%s3710_s1 + $0x18] sm:$0xff] }
   0x4   :  { %v2915_v9 = vpack.c.bf16 %v18_v8, %v17_v7  ;;  %2921 = vmatpush3.bf16.msra.mxu1 %v3273_v5  ;;  %2628 = vmatprep.mubr.msk.f32.mxu0 %vm47_vm1, %v35_v10  ;;  %v36_v14 = vld [vmem:[%s3711_s0 + $0x8] sm:$0xff]  ;;  %v3303_v15 = vpack.c.bf16 %v20_v13, %v19_v12  ;;  %v21_v16 = vld [vmem:[%s3710_s1 + $0x20] sm:$0xff]  ;;  %v23_v36 = vld [vmem:[%s3710_s1 + $0x30] sm:$0xff] }
   0x5   :  { %2922 = vmatprep.subr.bf16.mxu1 %v3231_v0  ;;  %v22_v17 = vld [vmem:[%s3710_s1 + $0x28] sm:$0xff]  ;;  %v3334_v21 = vld [vmem:[%s3712_s2] ss:$0 sm:$0xff]  ;;  %v24_v37 = vld [vmem:[%s3710_s1 + $0x38] sm:$0xff] }
   0x6   :  { %2916 = vmatprep.subr.bf16.mxu0 %v2915_v9  ;;  %v3317_v18 = vpack.c.bf16 %v22_v17, %v21_v16  ;;  %v25_v38 = vld [vmem:[%s3710_s1 + $0x40] sm:$0xff]  ;;  %v3351_v39 = vpack.c.bf16 %v24_v37, %v23_v36  ;;  %v26_v40 = vld [vmem:[%s3710_s1 + $0x48] sm:$0xff]  ;;  %v37_v60 = vld [vmem:[%s3711_s0 + $0x10] sm:$0xff] }
   0x7   :  { %2918 = vmatpush3.bf16.msra.mxu0 %v2915_v9  ;;  %v3357_v41 = vpack.c.bf16 %v26_v40, %v25_v38  ;;  %v3374_v46 = vld [vmem:[%s3712_s2 + $0x1] ss:$0 sm:$0xff]  ;;  %v38_v61 = vld [vmem:[%s3711_s0 + $0x18] sm:$0xff]  ;;  %v40_v63 = vld [vmem:[%s3711_s0 + $0x28] sm:$0xff] }
   0x8   :  { %2937 = vmatprep.subr.bf16.mxu0 %v3231_v0  ;;  %2924 = vmatpush3.bf16.msra.mxu1 %v3288_v11  ;;  %v39_v62 = vld [vmem:[%s3711_s0 + $0x20] sm:$0xff]  ;;  %v41_v1 = vld [vmem:[%s3711_s0 + $0x30] sm:$0xff]  ;;  %v42_v2 = vld [vmem:[%s3711_s0 + $0x38] sm:$0xff] }
   0x9   :  { %2925 = vmatprep.subr.bf16.mxu1 %v3231_v0 }
   0xa   :  { %2629 = vmatmul.mubr.msk.f32.vlgmr.msra.gmra.mrb[0].mxu0 %vm47_vm1, %v36_v14 }
   0xb   :  { %2939 = vmatpush3.bf16.msra.mxu0 %v3273_v5  ;;  %2649 = vmatmul.mubr.f32.vlgmr.msra.gmra.mrb[0].mxu1 %v3233_v4 }
   0xc   :  { %2940 = vmatprep.subr.bf16.mxu0 %v3231_v0  ;;  %2927 = vmatpush3.bf16.msra.mxu1 %v3303_v15 }
   0xd   :  { %2659 = vmatprep.mubr.msk.f32.mxu1 %vm3232_vm0, %v3233_v4  ;;  %2928 = vmatprep.subr.bf16.mxu1 %v3231_v0 }
   0xe   :  { %2631 = vmatprep.mubr.msk.f32.mxu0 %vm47_vm1, %v37_v60 }
   0xf   :  { %2942 = vmatpush3.bf16.msra.mxu0 %v3288_v11 }
  0x10   :  { %2943 = vmatprep.subr.bf16.mxu0 %v3231_v0  ;;  %2930 = vmatpush3.bf16.msra.mxu1 %v3317_v18 }
  0x11   :  { %2931 = vmatprep.subr.bf16.mxu1 %v3231_v0  ;;  %2632 = vmatmul.mubr.msk.f32.gmra.mrb[2].mxu0 %vm47_vm1, %v38_v61 }
  0x12   :  { %2634 = vmatprep.mubr.msk.f32.mxu0 %vm47_vm1, %v39_v62 }
  0x13   :  { %2660 = vmatmul.mubr.f32.vlgmr.msra.gmra.mrb[2].mxu1 %v3233_v4 }
  0x14   :  { %2670 = vmatprep.mubr.msk.f32.mxu1 %vm3232_vm0, %v3233_v4  ;;  %2933 = vmatpush3.bf16.msra.mxu1 %v3351_v39 }
  0x15   :  { %2934 = vmatprep.subr.bf16.mxu1 %v3231_v0  ;;  %2635 = vmatmul.mubr.msk.f32.gmra.mrb[4].mxu0 %vm47_vm1, %v40_v63 }
  0x16   :  { %2637 = vmatprep.mubr.msk.f32.mxu0 %vm47_vm1, %v41_v1 }
  0x18   :  { %2936 = vmatpush3.bf16.msra.mxu1 %v3357_v41 }
  0x19   :  { %2955 = vmatprep.subr.bf16.mxu1 %v3231_v0  ;;  %2638 = vmatmul.mubr.msk.f32.gmra.mrb[6].mxu0 %vm47_vm1, %v42_v2 }
  0x1a   :  { %2681 = vmatprep.mubr.msk.f32.mxu0 %vm3232_vm0, %v3233_v4 }
  0xdd   :  { %v3329_v19 = vpop.f32.mrb[0].mxu0 }
  0xde   :  { %v138_v20 = vpop.f32.mrb[1].mxu0  ;;  %v144_v17 = vadd.f32 %v3329_v19, %v3334_v21 }
  0xdf   :  { %v139_v22 = vadd.f32 %v3334_v21, %v138_v20 }
  0xe4   :  { %v3410_v8 = vpop.f32.mrb[2].mxu0 }
  0xe5   :  { %v3412_v9 = vpop.f32.mrb[3].mxu0 }
  0xe6   :  { %v321_v23 = vpop.f32.mrb[2].mxu1 }
  0xe7   :  { %v325_v24 = vadd.f32 %v321_v23, %v139_v22  ;;  %v2661_v25 = vpop.f32.mrb[3].mxu1 }
  0xe8   :  { %v3414_v10 = vpop.f32.mrb[4].mxu0 }
  0xe9   :  { %3098 = vtanh.f32 %v325_v24  ;;  %v2447_v27 = vmul.f32 -1.442695, %v325_v24  ;;  %v3416_v12 = vpop.f32.mrb[5].mxu0 }
  0xeb   :  { %3100 = vpow2.f32 %v2447_v27 }
  0xec   :  { %v3418_v13 = vpop.f32.mrb[6].mxu0 }
  0xed   :  { %v3420_v14 = vpop.f32.mrb[7].mxu0 }
  0xf3   :  { %v3099_v26 = vpop.eup %3098 }
  0xf4   :  { %335 = vrot.lane.b32.xlu0 %v3099_v26, %s3234_s15 }
  0xf5   :  { %v3101_v28 = vpop.eup %3100 }
  0xf6   :  { %v329_v29 = vadd.f32 1.0, %v3101_v28 }
  0xf8   :  { %3102 = vrcp.f32 %v329_v29 }
 0x102   :  { %v3103_v30 = vpop.eup %3102 }
 0x103   :  { %v333_v33 = vmul.f32 0.0, %v3103_v30 }
 0x166   :  { %v336_v31 = vpop.permute.xlu0 %335 }
 0x167   :  { %v338_v32 = vmul.f32 %v3103_v30, %v336_v31 }
 0x169   :  { %340 = vrot.lane.b32.xlu0 %v338_v32, %s3234_s15 }
 0x1db   :  { %v341_v34 = vpop.permute.xlu0 %340 }
 0x1dc   :  { %v3339_v35 = vadd.f32 %v341_v34, %v333_v33 }
 0x1de   :  { %3104 = vtanh.f32 %v3339_v35 }
 0x1e8   :  { %v3105_v42 = vpop.eup %3104 }
 0x1e9   :  { %346 = vrot.lane.b32.xlu1 %v3105_v42, %s3234_s15 }
 0x25b   :  { %v347_v43 = vpop.permute.xlu1 %346 }
 0x25c   :  { %v349_v44 = vmul.f32 %v3103_v30, %v347_v43 }
 0x25e   :  { %351 = vrot.lane.b32.xlu1 %v349_v44, %s3235_s24 }
 0x2d0   :  { %v352_v45 = vpop.permute.xlu1 %351 }
 0x2d1   :  { %2671 = vmatmul.mubr.msk.f32.vlgmr.msra.gmra.mrb[0].mxu1 %vm181_vm2, %v352_v45 }
 0x2d2   :  { %2957 = vmatpush3.bf16.msra.mxu1 %v3273_v5  ;;  %2714 = vmatprep.mubr.msk.f32.mxu1 %vm3232_vm0, %v3233_v4 }
 0x2d3   :  { %2958 = vmatprep.subr.bf16.mxu1 %v3231_v0 }
 0x2d6   :  { %2960 = vmatpush3.bf16.msra.mxu1 %v3288_v11 }
 0x2d7   :  { %2961 = vmatprep.subr.bf16.mxu1 %v3231_v0 }
 0x3a4   :  { %v421_v47 = vpop.f32.mrb[0].mxu1 }
 0x3a5   :  { %v3069_v48 = vadd.f32 %v3374_v46, %v421_v47  ;;  %v2672_v49 = vpop.f32.mrb[1].mxu1 }
 0x3a7   :  { %3106 = vtanh.f32 %v3069_v48  ;;  %v2449_v51 = vmul.f32 -1.442695, %v3069_v48 }
 0x3a9   :  { %3108 = vpow2.f32 %v2449_v51 }
 0x3b1   :  { %v3107_v50 = vpop.eup %3106 }
 0x3b2   :  { %434 = vrot.lane.b32.xlu0 %v3107_v50, %s3234_s15 }
 0x3b3   :  { %v3109_v52 = vpop.eup %3108 }
 0x3b4   :  { %v428_v53 = vadd.f32 1.0, %v3109_v52 }
 0x3b6   :  { %3110 = vrcp.f32 %v428_v53 }
 0x3c0   :  { %v3111_v54 = vpop.eup %3110 }
 0x3c1   :  { %v432_v57 = vmul.f32 0.0, %v3111_v54 }
 0x424   :  { %v435_v55 = vpop.permute.xlu0 %434 }
 0x425   :  { %v437_v56 = vmul.f32 %v3111_v54, %v435_v55 }
 0x427   :  { %439 = vrot.lane.b32.xlu1 %v437_v56, %s3234_s15 }
 0x499   :  { %v440_v58 = vpop.permute.xlu1 %439 }
 0x49a   :  { %v3379_v59 = vadd.f32 %v440_v58, %v432_v57  ;;  %v149_v57 = vadd.f32 %v3334_v21, %v3412_v9 }
 0x49c   :  { %3112 = vtanh.f32 %v3379_v59 }
 0x4a6   :  { %v3113_v3 = vpop.eup %3112 }
 0x4a7   :  { %445 = vrot.lane.b32.xlu0 %v3113_v3, %s3234_s15 }
 0x519   :  { %v446_v6 = vpop.permute.xlu0 %445 }
 0x51a   :  { %v448_v7 = vmul.f32 %v3111_v54, %v446_v6 }
 0x51c   :  { %450 = vrot.lane.b32.xlu1 %v448_v7, %s3235_s24 }
 0x58e   :  { %v451_v16 = vpop.permute.xlu1 %450 }
 0x58f   :  { %2682 = vmatmul.mubr.msk.f32.vlgmr.msra.gmra.mrb[8].mxu0 %vm181_vm2, %v451_v16 }
 0x590   :  { %2945 = vmatpush3.bf16.msra.mxu0 %v3303_v15  ;;  %2692 = vmatprep.mubr.msk.f32.mxu0 %vm3232_vm0, %v3233_v4 }
 0x591   :  { %2946 = vmatprep.subr.bf16.mxu0 %v3231_v0 }
 0x594   :  { %2948 = vmatpush3.bf16.msra.mxu0 %v3317_v18 }
 0x595   :  { %2949 = vmatprep.subr.bf16.mxu0 %v3231_v0 }
 0x597   :  { %2693 = vmatmul.mubr.msk.f32.vlgmr.msra.gmra.mrb[10].mxu0 %vm181_vm2, %v352_v45 }
 0x598   :  { %2951 = vmatpush3.bf16.msra.mxu0 %v3351_v39  ;;  %2703 = vmatprep.mubr.msk.f32.mxu0 %vm3232_vm0, %v3233_v4 }
 0x599   :  { %2952 = vmatprep.subr.bf16.mxu0 %v3231_v0 }
 0x59c   :  { %2954 = vmatpush3.bf16.msra.mxu0 %v3357_v41 }
 0x59d   :  { %2973 = vmatprep.subr.bf16.mxu0 %v3231_v0 }
 0x66a   :  { %v590_v20 = vpop.f32.mrb[10].mxu0 }
 0x66b   :  { %v594_v22 = vadd.f32 %v590_v20, %v144_v17  ;;  %v2694_v23 = vpop.f32.mrb[11].mxu0 }
 0x66d   :  { %3114 = vtanh.f32 %v594_v22  ;;  %v2452_v25 = vmul.f32 -1.442695, %v594_v22 }
 0x66f   :  { %3116 = vpow2.f32 %v2452_v25 }
 0x677   :  { %v3115_v24 = vpop.eup %3114 }
 0x678   :  { %604 = vrot.lane.b32.xlu0 %v3115_v24, %s3234_s15 }
 0x679   :  { %v3117_v26 = vpop.eup %3116 }
 0x67a   :  { %v598_v27 = vadd.f32 1.0, %v3117_v26 }
 0x67c   :  { %3118 = vrcp.f32 %v598_v27 }
 0x686   :  { %v3119_v28 = vpop.eup %3118 }
 0x687   :  { %v602_v31 = vmul.f32 %v3119_v28, %v3339_v35 }
 0x6ea   :  { %v605_v29 = vpop.permute.xlu0 %604 }
 0x6eb   :  { %v607_v30 = vmul.f32 %v3119_v28, %v605_v29 }
 0x6ed   :  { %609 = vrot.lane.b32.xlu1 %v607_v30, %s3234_s15 }
 0x75f   :  { %v610_v19 = vpop.permute.xlu1 %609 }
 0x760   :  { %v3441_v32 = vadd.f32 %v610_v19, %v602_v31 }
 0x762   :  { %3120 = vtanh.f32 %v3441_v32 }
 0x76c   :  { %v3121_v33 = vpop.eup %3120 }
 0x76d   :  { %615 = vrot.lane.b32.xlu0 %v3121_v33, %s3234_s15 }
 0x7df   :  { %v616_v34 = vpop.permute.xlu0 %615 }
 0x7e0   :  { %v618_v36 = vmul.f32 %v3119_v28, %v616_v34 }
 0x7e2   :  { %620 = vrot.lane.b32.xlu1 %v618_v36, %s3235_s24 }
 0x854   :  { %v621_v37 = vpop.permute.xlu1 %620 }
 0x855   :  { %2704 = vmatmul.mubr.msk.f32.vlgmr.msra.gmra.mrb[8].mxu0 %vm181_vm2, %v621_v37 }
 0x856   :  { %2975 = vmatpush3.bf16.msra.mxu0 %v3273_v5  ;;  %2747 = vmatprep.mubr.msk.f32.mxu0 %vm3232_vm0, %v3233_v4 }
 0x857   :  { %2976 = vmatprep.subr.bf16.mxu0 %v3231_v0 }
 0x85a   :  { %2978 = vmatpush3.bf16.msra.mxu0 %v3288_v11 }
 0x85b   :  { %2979 = vmatprep.subr.bf16.mxu0 %v3231_v0 }
 0x928   :  { %v690_v35 = vpop.f32.mrb[8].mxu0 }
 0x929   :  { %v3070_v38 = vadd.f32 %v3374_v46, %v690_v35  ;;  %v2705_v40 = vpop.f32.mrb[9].mxu0 }
 0x92b   :  { %3122 = vtanh.f32 %v3070_v38  ;;  %v2454_v43 = vmul.f32 -1.442695, %v3070_v38 }
 0x92d   :  { %3124 = vpow2.f32 %v2454_v43 }
 0x935   :  { %v3123_v42 = vpop.eup %3122 }
 0x936   :  { %703 = vrot.lane.b32.xlu0 %v3123_v42, %s3234_s15  ;;  %v154_v42 = vadd.f32 %v3410_v8, %v3334_v21 }
 0x937   :  { %v3125_v44 = vpop.eup %3124 }
 0x938   :  { %v697_v45 = vadd.f32 1.0, %v3125_v44 }
 0x93a   :  { %3126 = vrcp.f32 %v697_v45 }
 0x944   :  { %v3127_v47 = vpop.eup %3126 }
 0x945   :  { %v701_v50 = vmul.f32 %v3127_v47, %v3379_v59 }
 0x9a8   :  { %v704_v48 = vpop.permute.xlu0 %703 }
 0x9a9   :  { %v706_v49 = vmul.f32 %v3127_v47, %v704_v48 }
 0x9ab   :  { %708 = vrot.lane.b32.xlu1 %v706_v49, %s3234_s15 }
 0xa1d   :  { %v709_v51 = vpop.permute.xlu1 %708 }
 0xa1e   :  { %v3457_v52 = vadd.f32 %v709_v51, %v701_v50 }
 0xa20   :  { %3128 = vtanh.f32 %v3457_v52 }
 0xa2a   :  { %v3129_v53 = vpop.eup %3128 }
 0xa2b   :  { %714 = vrot.lane.b32.xlu0 %v3129_v53, %s3234_s15 }
 0xa9d   :  { %v715_v54 = vpop.permute.xlu0 %714 }
 0xa9e   :  { %v717_v55 = vmul.f32 %v3127_v47, %v715_v54 }
 0xaa0   :  { %719 = vrot.lane.b32.xlu1 %v717_v55, %s3235_s24 }
 0xb12   :  { %v720_v56 = vpop.permute.xlu1 %719 }
 0xb13   :  { %2715 = vmatmul.mubr.msk.f32.vlgmr.msra.gmra.mrb[4].mxu1 %vm181_vm2, %v720_v56 }
 0xb14   :  { %2963 = vmatpush3.bf16.msra.mxu1 %v3303_v15  ;;  %2725 = vmatprep.mubr.msk.f32.mxu1 %vm3232_vm0, %v3233_v4 }
 0xb15   :  { %2964 = vmatprep.subr.bf16.mxu1 %v3231_v0 }
 0xb18   :  { %2966 = vmatpush3.bf16.msra.mxu1 %v3317_v18 }
 0xb19   :  { %2967 = vmatprep.subr.bf16.mxu1 %v3231_v0 }
 0xb1b   :  { %2726 = vmatmul.mubr.msk.f32.vlgmr.msra.gmra.mrb[6].mxu1 %vm181_vm2, %v621_v37 }
 0xb1c   :  { %2969 = vmatpush3.bf16.msra.mxu1 %v3351_v39  ;;  %2736 = vmatprep.mubr.msk.f32.mxu1 %vm3232_vm0, %v3233_v4 }
 0xb1d   :  { %2970 = vmatprep.subr.bf16.mxu1 %v3231_v0 }
 0xb20   :  { %2972 = vmatpush3.bf16.msra.mxu1 %v3357_v41 }
 0xb21   :  { %2991 = vmatprep.subr.bf16.mxu1 %v3231_v0 }
 0xbee   :  { %v859_v58 = vpop.f32.mrb[6].mxu1 }
 0xbef   :  { %v863_v59 = vadd.f32 %v859_v58, %v149_v57  ;;  %v2727_v60 = vpop.f32.mrb[7].mxu1 }
 0xbf1   :  { %3130 = vtanh.f32 %v863_v59  ;;  %v2457_v62 = vmul.f32 -1.442695, %v863_v59 }
 0xbf3   :  { %3132 = vpow2.f32 %v2457_v62 }
 0xbfb   :  { %v3131_v61 = vpop.eup %3130 }
 0xbfc   :  { %873 = vrot.lane.b32.xlu0 %v3131_v61, %s3234_s15 }
 0xbfd   :  { %v3133_v63 = vpop.eup %3132 }
 0xbfe   :  { %v867_v1 = vadd.f32 1.0, %v3133_v63 }
 0xc00   :  { %3134 = vrcp.f32 %v867_v1 }
 0xc0a   :  { %v3135_v2 = vpop.eup %3134 }
 0xc0b   :  { %v871_v7 = vmul.f32 %v3135_v2, %v3441_v32 }
 0xc6e   :  { %v874_v3 = vpop.permute.xlu0 %873 }
 0xc6f   :  { %v876_v6 = vmul.f32 %v3135_v2, %v874_v3 }
 0xc71   :  { %878 = vrot.lane.b32.xlu1 %v876_v6, %s3234_s15 }
 0xce3   :  { %v879_v9 = vpop.permute.xlu1 %878 }
 0xce4   :  { %v3481_v16 = vadd.f32 %v879_v9, %v871_v7 }
 0xce6   :  { %3136 = vtanh.f32 %v3481_v16 }
 0xcf0   :  { %v3137_v17 = vpop.eup %3136 }
 0xcf1   :  { %884 = vrot.lane.b32.xlu0 %v3137_v17, %s3234_s15 }
 0xd63   :  { %v885_v20 = vpop.permute.xlu0 %884 }
 0xd64   :  { %v887_v22 = vmul.f32 %v3135_v2, %v885_v20 }
 0xd66   :  { %889 = vrot.lane.b32.xlu1 %v887_v22, %s3235_s24 }
 0xdd8   :  { %v890_v23 = vpop.permute.xlu1 %889 }
 0xdd9   :  { %2737 = vmatmul.mubr.msk.f32.vlgmr.msra.gmra.mrb[4].mxu1 %vm181_vm2, %v890_v23 }
 0xdda   :  { %2993 = vmatpush3.bf16.msra.mxu1 %v3273_v5  ;;  %2780 = vmatprep.mubr.msk.f32.mxu1 %vm3232_vm0, %v3233_v4 }
 0xddb   :  { %2994 = vmatprep.subr.bf16.mxu1 %v3231_v0 }
 0xdde   :  { %2996 = vmatpush3.bf16.msra.mxu1 %v3288_v11 }
 0xddf   :  { %2997 = vmatprep.subr.bf16.mxu1 %v3231_v0 }
 0xeac   :  { %v959_v24 = vpop.f32.mrb[4].mxu1 }
 0xead   :  { %v3071_v25 = vadd.f32 %v3374_v46, %v959_v24  ;;  %v2738_v26 = vpop.f32.mrb[5].mxu1 }
 0xeae   :  { %v159_v26 = vadd.f32 %v3334_v21, %v3416_v12 }
 0xeaf   :  { %3138 = vtanh.f32 %v3071_v25  ;;  %v2459_v28 = vmul.f32 -1.442695, %v3071_v25 }
 0xeb1   :  { %3140 = vpow2.f32 %v2459_v28 }
 0xeb9   :  { %v3139_v27 = vpop.eup %3138 }
 0xeba   :  { %972 = vrot.lane.b32.xlu0 %v3139_v27, %s3234_s15 }
 0xebb   :  { %v3141_v29 = vpop.eup %3140 }
 0xebc   :  { %v966_v30 = vadd.f32 1.0, %v3141_v29 }
 0xebe   :  { %3142 = vrcp.f32 %v966_v30 }
 0xec8   :  { %v3143_v31 = vpop.eup %3142 }
 0xec9   :  { %v970_v33 = vmul.f32 %v3143_v31, %v3457_v52 }
 0xf2c   :  { %v973_v19 = vpop.permute.xlu0 %972 }
 0xf2d   :  { %v975_v32 = vmul.f32 %v3143_v31, %v973_v19 }
 0xf2f   :  { %977 = vrot.lane.b32.xlu1 %v975_v32, %s3234_s15 }
 0xfa1   :  { %v978_v34 = vpop.permute.xlu1 %977 }
 0xfa2   :  { %v3497_v36 = vadd.f32 %v978_v34, %v970_v33 }
 0xfa4   :  { %3144 = vtanh.f32 %v3497_v36 }
 0xfae   :  { %v3145_v37 = vpop.eup %3144 }
 0xfaf   :  { %983 = vrot.lane.b32.xlu0 %v3145_v37, %s3234_s15 }
0x1021   :  { %v984_v35 = vpop.permute.xlu0 %983 }
0x1022   :  { %v986_v38 = vmul.f32 %v3143_v31, %v984_v35 }
0x1024   :  { %988 = vrot.lane.b32.xlu1 %v986_v38, %s3235_s24 }
0x1096   :  { %v989_v40 = vpop.permute.xlu1 %988 }
0x1097   :  { %2748 = vmatmul.mubr.msk.f32.vlgmr.msra.gmra.mrb[12].mxu0 %vm181_vm2, %v989_v40 }
0x1098   :  { %2981 = vmatpush3.bf16.msra.mxu0 %v3303_v15  ;;  %2758 = vmatprep.mubr.msk.f32.mxu0 %vm3232_vm0, %v3233_v4 }
0x1099   :  { %2982 = vmatprep.subr.bf16.mxu0 %v3231_v0 }
0x109c   :  { %2984 = vmatpush3.bf16.msra.mxu0 %v3317_v18 }
0x109d   :  { %2985 = vmatprep.subr.bf16.mxu0 %v3231_v0 }
0x109f   :  { %2759 = vmatmul.mubr.msk.f32.vlgmr.msra.gmra.mrb[14].mxu0 %vm181_vm2, %v890_v23 }
0x10a0   :  { %2987 = vmatpush3.bf16.msra.mxu0 %v3351_v39  ;;  %2769 = vmatprep.mubr.msk.f32.mxu0 %vm3232_vm0, %v3233_v4 }
0x10a1   :  { %2988 = vmatprep.subr.bf16.mxu0 %v3231_v0 }
0x10a4   :  { %2990 = vmatpush3.bf16.msra.mxu0 %v3357_v41 }
0x10a5   :  { %3009 = vmatprep.subr.bf16.mxu0 %v3231_v0 }
0x1172   :  { %v1128_v43 = vpop.f32.mrb[14].mxu0 }
0x1173   :  { %v1132_v44 = vadd.f32 %v1128_v43, %v154_v42  ;;  %v2760_v45 = vpop.f32.mrb[15].mxu0 }
0x1175   :  { %3146 = vtanh.f32 %v1132_v44  ;;  %v2462_v48 = vmul.f32 -1.442695, %v1132_v44 }
0x1177   :  { %3148 = vpow2.f32 %v2462_v48 }
0x117f   :  { %v3147_v47 = vpop.eup %3146 }
0x1180   :  { %1142 = vrot.lane.b32.xlu0 %v3147_v47, %s3234_s15 }
0x1181   :  { %v3149_v49 = vpop.eup %3148 }
0x1182   :  { %v1136_v50 = vadd.f32 1.0, %v3149_v49 }
0x1184   :  { %3150 = vrcp.f32 %v1136_v50 }
0x118e   :  { %v3151_v51 = vpop.eup %3150 }
0x118f   :  { %v1140_v54 = vmul.f32 %v3151_v51, %v3481_v16 }
0x11f2   :  { %v1143_v52 = vpop.permute.xlu0 %1142 }
0x11f3   :  { %v1145_v53 = vmul.f32 %v3151_v51, %v1143_v52 }
0x11f5   :  { %1147 = vrot.lane.b32.xlu1 %v1145_v53, %s3234_s15 }
0x1267   :  { %v1148_v8 = vpop.permute.xlu1 %1147 }
0x1268   :  { %v3521_v55 = vadd.f32 %v1148_v8, %v1140_v54 }
0x126a   :  { %3152 = vtanh.f32 %v3521_v55 }
0x1274   :  { %v3153_v56 = vpop.eup %3152 }
0x1275   :  { %1153 = vrot.lane.b32.xlu0 %v3153_v56, %s3234_s15 }
0x12e7   :  { %v1154_v57 = vpop.permute.xlu0 %1153 }
0x12e8   :  { %v1156_v58 = vmul.f32 %v3151_v51, %v1154_v57 }
0x12ea   :  { %1158 = vrot.lane.b32.xlu1 %v1156_v58, %s3235_s24 }
0x135c   :  { %v1159_v59 = vpop.permute.xlu1 %1158 }
0x135d   :  { %2770 = vmatmul.mubr.msk.f32.vlgmr.msra.gmra.mrb[12].mxu0 %vm181_vm2, %v1159_v59 }
0x135e   :  { %3011 = vmatpush3.bf16.msra.mxu0 %v3273_v5  ;;  %2813 = vmatprep.mubr.msk.f32.mxu0 %vm3232_vm0, %v3233_v4 }
0x135f   :  { %3012 = vmatprep.subr.bf16.mxu0 %v3231_v0 }
0x1362   :  { %3014 = vmatpush3.bf16.msra.mxu0 %v3288_v11 }
0x1363   :  { %3015 = vmatprep.subr.bf16.mxu0 %v3231_v0 }
0x1430   :  { %v1228_v60 = vpop.f32.mrb[12].mxu0 }
0x1431   :  { %v3072_v61 = vadd.f32 %v3374_v46, %v1228_v60  ;;  %v2771_v62 = vpop.f32.mrb[13].mxu0 }
0x1433   :  { %3154 = vtanh.f32 %v3072_v61  ;;  %v2464_v1 = vmul.f32 -1.442695, %v3072_v61  ;;  %v164_v61 = vadd.f32 %v3414_v10, %v3334_v21 }
0x1435   :  { %3156 = vpow2.f32 %v2464_v1 }
0x143d   :  { %v3155_v63 = vpop.eup %3154 }
0x143e   :  { %1241 = vrot.lane.b32.xlu0 %v3155_v63, %s3234_s15 }
0x143f   :  { %v3157_v2 = vpop.eup %3156 }
0x1440   :  { %v1235_v3 = vadd.f32 1.0, %v3157_v2 }
0x1442   :  { %3158 = vrcp.f32 %v1235_v3 }
0x144c   :  { %v3159_v6 = vpop.eup %3158 }
0x144d   :  { %v1239_v16 = vmul.f32 %v3159_v6, %v3497_v36 }
0x14b0   :  { %v1242_v7 = vpop.permute.xlu0 %1241 }
0x14b1   :  { %v1244_v9 = vmul.f32 %v3159_v6, %v1242_v7 }
0x14b3   :  { %1246 = vrot.lane.b32.xlu1 %v1244_v9, %s3234_s15 }
0x1525   :  { %v1247_v17 = vpop.permute.xlu1 %1246 }
0x1526   :  { %v3537_v20 = vadd.f32 %v1247_v17, %v1239_v16 }
0x1528   :  { %3160 = vtanh.f32 %v3537_v20 }
0x1532   :  { %v3161_v22 = vpop.eup %3160 }
0x1533   :  { %1252 = vrot.lane.b32.xlu0 %v3161_v22, %s3234_s15 }
0x15a5   :  { %v1253_v23 = vpop.permute.xlu0 %1252 }
0x15a6   :  { %v1255_v24 = vmul.f32 %v3159_v6, %v1253_v23 }
0x15a8   :  { %1257 = vrot.lane.b32.xlu1 %v1255_v24, %s3235_s24 }
0x161a   :  { %v1258_v25 = vpop.permute.xlu1 %1257 }
0x161b   :  { %2781 = vmatmul.mubr.msk.f32.vlgmr.msra.gmra.mrb[8].mxu1 %vm181_vm2, %v1258_v25 }
0x161c   :  { %2999 = vmatpush3.bf16.msra.mxu1 %v3303_v15  ;;  %2791 = vmatprep.mubr.msk.f32.mxu1 %vm3232_vm0, %v3233_v4 }
0x161d   :  { %3000 = vmatprep.subr.bf16.mxu1 %v3231_v0 }
0x1620   :  { %3002 = vmatpush3.bf16.msra.mxu1 %v3317_v18 }
0x1621   :  { %3003 = vmatprep.subr.bf16.mxu1 %v3231_v0 }
0x1623   :  { %2792 = vmatmul.mubr.msk.f32.vlgmr.msra.gmra.mrb[10].mxu1 %vm181_vm2, %v1159_v59 }
0x1624   :  { %3005 = vmatpush3.bf16.msra.mxu1 %v3351_v39  ;;  %2802 = vmatprep.mubr.msk.f32.mxu1 %vm3232_vm0, %v3233_v4 }
0x1625   :  { %3006 = vmatprep.subr.bf16.mxu1 %v3231_v0 }
0x1628   :  { %3008 = vmatpush3.bf16.msra.mxu1 %v3357_v41 }
0x1629   :  { %3027 = vmatprep.subr.bf16.mxu1 %v3231_v0 }
0x16f6   :  { %v1397_v27 = vpop.f32.mrb[10].mxu1 }
0x16f7   :  { %v1401_v28 = vadd.f32 %v1397_v27, %v159_v26  ;;  %v2793_v29 = vpop.f32.mrb[11].mxu1 }
0x16f9   :  { %3162 = vtanh.f32 %v1401_v28  ;;  %v2467_v31 = vmul.f32 -1.442695, %v1401_v28 }
0x16fb   :  { %3164 = vpow2.f32 %v2467_v31 }
0x1703   :  { %v3163_v30 = vpop.eup %3162 }
0x1704   :  { %1411 = vrot.lane.b32.xlu0 %v3163_v30, %s3234_s15 }
0x1705   :  { %v3165_v19 = vpop.eup %3164 }
0x1706   :  { %v1405_v32 = vadd.f32 1.0, %v3165_v19 }
0x1708   :  { %3166 = vrcp.f32 %v1405_v32 }
0x1712   :  { %v3167_v33 = vpop.eup %3166 }
0x1713   :  { %v1409_v37 = vmul.f32 %v3167_v33, %v3521_v55 }
0x1776   :  { %v1412_v34 = vpop.permute.xlu0 %1411 }
0x1777   :  { %v1414_v36 = vmul.f32 %v3167_v33, %v1412_v34 }
0x1779   :  { %1416 = vrot.lane.b32.xlu1 %v1414_v36, %s3234_s15 }
0x17eb   :  { %v1417_v12 = vpop.permute.xlu1 %1416 }
0x17ec   :  { %v3561_v35 = vadd.f32 %v1417_v12, %v1409_v37 }
0x17ee   :  { %3168 = vtanh.f32 %v3561_v35 }
0x17f8   :  { %v3169_v38 = vpop.eup %3168 }
0x17f9   :  { %1422 = vrot.lane.b32.xlu0 %v3169_v38, %s3234_s15 }
0x186b   :  { %v1423_v40 = vpop.permute.xlu0 %1422 }
0x186c   :  { %v1425_v42 = vmul.f32 %v3167_v33, %v1423_v40 }
0x186e   :  { %1427 = vrot.lane.b32.xlu1 %v1425_v42, %s3235_s24  ;;  %v169_v42 = vadd.f32 %v3334_v21, %v3420_v14 }
0x18e0   :  { %v1428_v43 = vpop.permute.xlu1 %1427 }
0x18e1   :  { %2803 = vmatmul.mubr.msk.f32.vlgmr.msra.gmra.mrb[8].mxu1 %vm181_vm2, %v1428_v43 }
0x18e2   :  { %3029 = vmatpush3.bf16.msra.mxu1 %v3273_v5  ;;  %2846 = vmatprep.mubr.msk.f32.mxu1 %vm3232_vm0, %v3233_v4 }
0x18e3   :  { %3030 = vmatprep.subr.bf16.mxu1 %v3231_v0 }
0x18e6   :  { %3032 = vmatpush3.bf16.msra.mxu1 %v3288_v11 }
0x18e7   :  { %3033 = vmatprep.subr.bf16.mxu1 %v3231_v0 }
0x19b4   :  { %v1497_v44 = vpop.f32.mrb[8].mxu1 }
0x19b5   :  { %v3073_v45 = vadd.f32 %v3374_v46, %v1497_v44  ;;  %v2804_v47 = vpop.f32.mrb[9].mxu1 }
0x19b7   :  { %3170 = vtanh.f32 %v3073_v45  ;;  %v2469_v49 = vmul.f32 -1.442695, %v3073_v45 }
0x19b9   :  { %3172 = vpow2.f32 %v2469_v49 }
0x19c1   :  { %v3171_v48 = vpop.eup %3170 }
0x19c2   :  { %1510 = vrot.lane.b32.xlu0 %v3171_v48, %s3234_s15 }
0x19c3   :  { %v3173_v50 = vpop.eup %3172 }
0x19c4   :  { %v1504_v51 = vadd.f32 1.0, %v3173_v50 }
0x19c6   :  { %3174 = vrcp.f32 %v1504_v51 }
0x19d0   :  { %v3175_v52 = vpop.eup %3174 }
0x19d1   :  { %v1508_v8 = vmul.f32 %v3175_v52, %v3537_v20 }
0x1a34   :  { %v1511_v53 = vpop.permute.xlu0 %1510 }
0x1a35   :  { %v1513_v54 = vmul.f32 %v3175_v52, %v1511_v53 }
0x1a37   :  { %1515 = vrot.lane.b32.xlu1 %v1513_v54, %s3234_s15 }
0x1aa9   :  { %v1516_v55 = vpop.permute.xlu1 %1515 }
0x1aaa   :  { %v3577_v56 = vadd.f32 %v1516_v55, %v1508_v8 }
0x1aac   :  { %3176 = vtanh.f32 %v3577_v56 }
0x1ab6   :  { %v3177_v57 = vpop.eup %3176 }
0x1ab7   :  { %1521 = vrot.lane.b32.xlu0 %v3177_v57, %s3234_s15 }
0x1b29   :  { %v1522_v58 = vpop.permute.xlu0 %1521 }
0x1b2a   :  { %v1524_v59 = vmul.f32 %v3175_v52, %v1522_v58 }
0x1b2c   :  { %1526 = vrot.lane.b32.xlu1 %v1524_v59, %s3235_s24 }
0x1b9e   :  { %v1527_v60 = vpop.permute.xlu1 %1526 }
0x1b9f   :  { %2814 = vmatmul.mubr.msk.f32.vlgmr.msra.gmra.mrb[16].mxu0 %vm181_vm2, %v1527_v60 }
0x1ba0   :  { %3017 = vmatpush3.bf16.msra.mxu0 %v3303_v15  ;;  %2824 = vmatprep.mubr.msk.f32.mxu0 %vm3232_vm0, %v3233_v4 }
0x1ba1   :  { %3018 = vmatprep.subr.bf16.mxu0 %v3231_v0 }
0x1ba4   :  { %3020 = vmatpush3.bf16.msra.mxu0 %v3317_v18 }
0x1ba5   :  { %3021 = vmatprep.subr.bf16.mxu0 %v3231_v0 }
0x1ba7   :  { %2825 = vmatmul.mubr.msk.f32.vlgmr.msra.gmra.mrb[18].mxu0 %vm181_vm2, %v1428_v43 }
0x1ba8   :  { %3023 = vmatpush3.bf16.msra.mxu0 %v3351_v39  ;;  %2835 = vmatprep.mubr.msk.f32.mxu0 %vm3232_vm0, %v3233_v4 }
0x1ba9   :  { %3024 = vmatprep.subr.bf16.mxu0 %v3231_v0 }
0x1bac   :  { %3026 = vmatpush3.bf16.msra.mxu0 %v3357_v41 }
0x1bad   :  { %3045 = vmatprep.subr.bf16.mxu0 %v3231_v0 }
0x1c7a   :  { %v1666_v62 = vpop.f32.mrb[18].mxu0 }
0x1c7b   :  { %v1670_v63 = vadd.f32 %v1666_v62, %v164_v61  ;;  %v2826_v1 = vpop.f32.mrb[19].mxu0 }
0x1c7d   :  { %3178 = vtanh.f32 %v1670_v63  ;;  %v2472_v3 = vmul.f32 -1.442695, %v1670_v63 }
0x1c7f   :  { %3180 = vpow2.f32 %v2472_v3 }
0x1c87   :  { %v3179_v2 = vpop.eup %3178 }
0x1c88   :  { %1680 = vrot.lane.b32.xlu0 %v3179_v2, %s3234_s15 }
0x1c89   :  { %v3181_v6 = vpop.eup %3180 }
0x1c8a   :  { %v1674_v7 = vadd.f32 1.0, %v3181_v6 }
0x1c8c   :  { %3182 = vrcp.f32 %v1674_v7 }
0x1c96   :  { %v3183_v9 = vpop.eup %3182 }
0x1c97   :  { %v1678_v20 = vmul.f32 %v3183_v9, %v3561_v35 }
0x1cfa   :  { %v1681_v16 = vpop.permute.xlu0 %1680 }
0x1cfb   :  { %v1683_v17 = vmul.f32 %v3183_v9, %v1681_v16 }
0x1cfd   :  { %1685 = vrot.lane.b32.xlu1 %v1683_v17, %s3234_s15 }
0x1d6f   :  { %v1686_v10 = vpop.permute.xlu1 %1685 }
0x1d70   :  { %v3601_v22 = vadd.f32 %v1686_v10, %v1678_v20 }
0x1d72   :  { %3184 = vtanh.f32 %v3601_v22 }
0x1d7c   :  { %v3185_v23 = vpop.eup %3184 }
0x1d7d   :  { %1691 = vrot.lane.b32.xlu0 %v3185_v23, %s3234_s15 }
0x1def   :  { %v1692_v24 = vpop.permute.xlu0 %1691 }
0x1df0   :  { %v1694_v25 = vmul.f32 %v3183_v9, %v1692_v24 }
0x1df2   :  { %1696 = vrot.lane.b32.xlu1 %v1694_v25, %s3235_s24 }
0x1e64   :  { %v1697_v26 = vpop.permute.xlu1 %1696 }
0x1e65   :  { %2836 = vmatmul.mubr.msk.f32.vlgmr.msra.gmra.mrb[16].mxu0 %vm181_vm2, %v1697_v26 }
0x1e66   :  { %3047 = vmatpush3.bf16.msra.mxu0 %v3273_v5  ;;  %2879 = vmatprep.mubr.msk.f32.mxu0 %vm3232_vm0, %v3233_v4 }
0x1e67   :  { %3048 = vmatprep.subr.bf16.mxu0 %v3231_v0 }
0x1e6a   :  { %3050 = vmatpush3.bf16.msra.mxu0 %v3288_v11 }
0x1e6b   :  { %3051 = vmatprep.subr.bf16.mxu0 %v3231_v0 }
0x1f38   :  { %v1766_v27 = vpop.f32.mrb[16].mxu0 }
0x1f39   :  { %v3074_v28 = vadd.f32 %v3374_v46, %v1766_v27  ;;  %v2837_v29 = vpop.f32.mrb[17].mxu0 }
0x1f3b   :  { %3186 = vtanh.f32 %v3074_v28  ;;  %v2474_v31 = vmul.f32 -1.442695, %v3074_v28 }
0x1f3d   :  { %3188 = vpow2.f32 %v2474_v31 }
0x1f45   :  { %v3187_v30 = vpop.eup %3186 }
0x1f46   :  { %1779 = vrot.lane.b32.xlu0 %v3187_v30, %s3234_s15 }
0x1f47   :  { %v3189_v5 = vpop.eup %3188 }
0x1f48   :  { %v1773_v19 = vadd.f32 1.0, %v3189_v5 }
0x1f4a   :  { %3190 = vrcp.f32 %v1773_v19 }
0x1f54   :  { %v3191_v32 = vpop.eup %3190 }
0x1f55   :  { %v1777_v11 = vmul.f32 %v3191_v32, %v3577_v56 }
0x1fb8   :  { %v1780_v33 = vpop.permute.xlu0 %1779 }
0x1fb9   :  { %v1782_v34 = vmul.f32 %v3191_v32, %v1780_v33 }
0x1fbb   :  { %1784 = vrot.lane.b32.xlu1 %v1782_v34, %s3234_s15 }
0x202d   :  { %v1785_v36 = vpop.permute.xlu1 %1784 }
0x202e   :  { %v3617_v37 = vadd.f32 %v1785_v36, %v1777_v11 }
0x2030   :  { %3192 = vtanh.f32 %v3617_v37 }
0x203a   :  { %v3193_v12 = vpop.eup %3192 }
0x203b   :  { %1790 = vrot.lane.b32.xlu0 %v3193_v12, %s3234_s15 }
0x20ad   :  { %v1791_v35 = vpop.permute.xlu0 %1790 }
0x20ae   :  { %v1793_v38 = vmul.f32 %v3191_v32, %v1791_v35 }
0x20b0   :  { %1795 = vrot.lane.b32.xlu1 %v1793_v38, %s3235_s24 }
0x2122   :  { %v1796_v40 = vpop.permute.xlu1 %1795 }
0x2123   :  { %2847 = vmatmul.mubr.msk.f32.vlgmr.msra.gmra.mrb[12].mxu1 %vm181_vm2, %v1796_v40 }
0x2124   :  { %3035 = vmatpush3.bf16.msra.mxu1 %v3303_v15  ;;  %2857 = vmatprep.mubr.msk.f32.mxu1 %vm3232_vm0, %v3233_v4 }
0x2125   :  { %3036 = vmatprep.subr.bf16.mxu1 %v3231_v0 }
0x2128   :  { %3038 = vmatpush3.bf16.msra.mxu1 %v3317_v18 }
0x2129   :  { %3039 = vmatprep.subr.bf16.mxu1 %v3231_v0 }
0x212b   :  { %2858 = vmatmul.mubr.msk.f32.vlgmr.msra.gmra.mrb[14].mxu1 %vm181_vm2, %v1697_v26 }
0x212c   :  { %3041 = vmatpush3.bf16.msra.mxu1 %v3351_v39  ;;  %2868 = vmatprep.mubr.msk.f32.mxu1 %vm3232_vm0, %v3233_v4 }
0x212d   :  { %3042 = vmatprep.subr.bf16.mxu1 %v3231_v0 }
0x2130   :  { %3044 = vmatpush3.bf16.msra.mxu1 %v3357_v41 }
0x2131   :  { %3063 = vmatprep.subr.bf16.mxu1 %v3231_v0 }
0x21fe   :  { %v1935_v43 = vpop.f32.mrb[14].mxu1 }
0x21ff   :  { %v1939_v44 = vadd.f32 %v1935_v43, %v169_v42  ;;  %v2859_v45 = vpop.f32.mrb[15].mxu1 }
0x2201   :  { %3194 = vtanh.f32 %v1939_v44  ;;  %v2477_v48 = vmul.f32 -1.442695, %v1939_v44 }
0x2203   :  { %3196 = vpow2.f32 %v2477_v48  ;;  %v2333_v48 = vld [vmem:[%s3713_s3 + $0x8] sm:$0xff] }
0x220b   :  { %v3195_v47 = vpop.eup %3194 }
0x220c   :  { %1949 = vrot.lane.b32.xlu0 %v3195_v47, %s3234_s15 }
0x220d   :  { %v3197_v49 = vpop.eup %3196 }
0x220e   :  { %v1943_v50 = vadd.f32 1.0, %v3197_v49  ;;  %v2334_v49 = vld [vmem:[%s3713_s3 + $0x10] sm:$0xff] }
0x2210   :  { %3198 = vrcp.f32 %v1943_v50 }
0x221a   :  { %v3199_v51 = vpop.eup %3198 }
0x221b   :  { %v1947_v54 = vmul.f32 %v3199_v51, %v3601_v22 }
0x227e   :  { %v1950_v52 = vpop.permute.xlu0 %1949 }
0x227f   :  { %v1952_v53 = vmul.f32 %v3199_v51, %v1950_v52 }
0x2281   :  { %1954 = vrot.lane.b32.xlu1 %v1952_v53, %s3234_s15 }
0x22f3   :  { %v1955_v21 = vpop.permute.xlu1 %1954 }
0x22f4   :  { %v3641_v14 = vadd.f32 %v1955_v21, %v1947_v54 }
0x22f6   :  { %3200 = vtanh.f32 %v3641_v14 }
0x2300   :  { %v3201_v8 = vpop.eup %3200 }
0x2301   :  { %1960 = vrot.lane.b32.xlu0 %v3201_v8, %s3234_s15  ;;  %v2485_v8 = vld [vmem:[%s3712_s2 + $0x2] ss:$0 sm:$0xff] }
0x2373   :  { %v1961_v55 = vpop.permute.xlu0 %1960 }
0x2374   :  { %v1963_v56 = vmul.f32 %v3199_v51, %v1961_v55  ;;  %v2335_v51 = vld [vmem:[%s3713_s3 + $0x18] sm:$0xff] }
0x2375   :  { %v3067_v52 = vpack.c.bf16 %v2335_v51, %v2334_v49 }
0x2376   :  { %1965 = vrot.lane.b32.xlu1 %v1963_v56, %s3235_s24 }
0x23e8   :  { %v1966_v57 = vpop.permute.xlu1 %1965 }
0x23e9   :  { %2869 = vmatmul.mubr.msk.f32.vlgmr.msra.gmra.mrb[12].mxu1 %vm181_vm2, %v1966_v57 }
0x23ea   :  { %2912 = vmatprep.mubr.msk.f32.mxu1 %vm3232_vm0, %v3233_v4 }
0x24bc   :  { %v2035_v58 = vpop.f32.mrb[12].mxu1 }
0x24bd   :  { %v3075_v59 = vadd.f32 %v3374_v46, %v2035_v58  ;;  %v2870_v60 = vpop.f32.mrb[13].mxu1 }
0x24bf   :  { %3202 = vtanh.f32 %v3075_v59  ;;  %v2479_v62 = vmul.f32 -1.442695, %v3075_v59 }
0x24c1   :  { %3204 = vpow2.f32 %v2479_v62 }
0x24c9   :  { %v3203_v61 = vpop.eup %3202 }
0x24ca   :  { %2048 = vrot.lane.b32.xlu0 %v3203_v61, %s3234_s15  ;;  %v2488_v61 = vld [vmem:[%s3712_s2 + $0x3] ss:$0 sm:$0xff] }
0x24cb   :  { %v3205_v63 = vpop.eup %3204 }
0x24cc   :  { %v2042_v1 = vadd.f32 1.0, %v3205_v63 }
0x24ce   :  { %3206 = vrcp.f32 %v2042_v1 }
0x24d8   :  { %v3207_v2 = vpop.eup %3206 }
0x24d9   :  { %v2046_v7 = vmul.f32 %v3207_v2, %v3617_v37 }
0x253c   :  { %v2049_v3 = vpop.permute.xlu0 %2048 }
0x253d   :  { %v2051_v6 = vmul.f32 %v3207_v2, %v2049_v3 }
0x253f   :  { %2053 = vrot.lane.b32.xlu1 %v2051_v6, %s3234_s15 }
0x25b1   :  { %v2054_v9 = vpop.permute.xlu1 %2053 }
0x25b2   :  { %v2056_v16 = vadd.f32 %v2054_v9, %v2046_v7 }
0x25b4   :  { %3208 = vtanh.f32 %v2056_v16 }
0x25be   :  { %v3209_v17 = vpop.eup %3208 }
0x25bf   :  { %2059 = vrot.lane.b32.xlu0 %v3209_v17, %s3234_s15 }
0x2631   :  { %v2060_v20 = vpop.permute.xlu0 %2059 }
0x2632   :  { %v2062_v10 = vmul.f32 %v3207_v2, %v2060_v20 }
0x2634   :  { %2064 = vrot.lane.b32.xlu1 %v2062_v10, %s3235_s24 }
0x26a6   :  { %v2065_v22 = vpop.permute.xlu1 %2064 }
0x26a7   :  { %2880 = vmatmul.mubr.msk.f32.vlgmr.msra.gmra.mrb[20].mxu0 %vm181_vm2, %v2065_v22 }
0x26a8   :  { %3053 = vmatpush3.bf16.msra.mxu0 %v3303_v15  ;;  %2890 = vmatprep.mubr.msk.f32.mxu0 %vm3232_vm0, %v3233_v4  ;;  %v3230_v15 = vld [vmem:[%s3712_s2] ss:$0 sm:$0xff] }
0x26a9   :  { %3054 = vmatprep.subr.bf16.mxu0 %v3231_v0  ;;  %v174_v23 = vadd.f32 %v3230_v15, %v3418_v13 }
0x26ac   :  { %3056 = vmatpush3.bf16.msra.mxu0 %v3317_v18 }
0x26ad   :  { %3057 = vmatprep.subr.bf16.mxu0 %v3231_v0 }
0x26af   :  { %2891 = vmatmul.mubr.msk.f32.vlgmr.msra.gmra.mrb[22].mxu0 %vm181_vm2, %v1966_v57 }
0x26b0   :  { %3059 = vmatpush3.bf16.msra.mxu0 %v3351_v39  ;;  %2901 = vmatprep.mubr.msk.f32.mxu0 %vm3232_vm0, %v3233_v4 }
0x26b1   :  { %3060 = vmatprep.subr.bf16.mxu0 %v3231_v0 }
0x26b4   :  { %3062 = vmatpush3.bf16.msra.mxu0 %v3357_v41 }
0x2782   :  { %v2204_v18 = vpop.f32.mrb[22].mxu0 }
0x2783   :  { %v2208_v24 = vadd.f32 %v2204_v18, %v174_v23  ;;  %v2892_v25 = vpop.f32.mrb[23].mxu0 }
0x2785   :  { %3210 = vtanh.f32 %v2208_v24  ;;  %v2482_v39 = vmul.f32 -1.442695, %v2208_v24 }
0x2787   :  { %3212 = vpow2.f32 %v2482_v39 }
0x278f   :  { %v3211_v26 = vpop.eup %3210 }
0x2790   :  { %2218 = vrot.lane.b32.xlu0 %v3211_v26, %s3234_s15 }
0x2791   :  { %v3213_v4 = vpop.eup %3212 }
0x2792   :  { %v2212_v27 = vadd.f32 1.0, %v3213_v4 }
0x2794   :  { %3214 = vrcp.f32 %v2212_v27 }
0x279e   :  { %v3215_v28 = vpop.eup %3214 }
0x279f   :  { %v2216_v30 = vmul.f32 %v3215_v28, %v3641_v14 }
0x2802   :  { %v2219_v41 = vpop.permute.xlu0 %2218 }
0x2803   :  { %v2221_v29 = vmul.f32 %v3215_v28, %v2219_v41 }
0x2805   :  { %2223 = vrot.lane.b32.xlu1 %v2221_v29, %s3234_s15 }
0x2877   :  { %v2224_v13 = vpop.permute.xlu1 %2223 }
0x2878   :  { %v2226_v31 = vadd.f32 %v2224_v13, %v2216_v30 }
0x287a   :  { %3216 = vtanh.f32 %v2226_v31 }
0x2884   :  { %v3217_v5 = vpop.eup %3216 }
0x2885   :  { %2229 = vrot.lane.b32.xlu0 %v3217_v5, %s3234_s15 }
0x28f7   :  { %v2230_v19 = vpop.permute.xlu0 %2229 }
0x28f8   :  { %v2232_v32 = vmul.f32 %v3215_v28, %v2230_v19 }
0x28fa   :  { %2234 = vrot.lane.b32.xlu1 %v2232_v32, %s3235_s24 }
0x296c   :  { %v2235_v33 = vpop.permute.xlu1 %2234 }
0x296d   :  { %2902 = vmatmul.mubr.msk.f32.vlgmr.msra.gmra.mrb[20].mxu0 %vm181_vm2, %v2235_v33 }
0x2a40   :  { %v2304_v34 = vpop.f32.mrb[20].mxu0 }
0x2a41   :  { %v3076_v11 = vadd.f32 %v3374_v46, %v2304_v34  ;;  %v2903_v36 = vpop.f32.mrb[21].mxu0  ;;  %v2332_v46 = vld [vmem:[%s3713_s3] sm:$0xff] }
0x2a42   :  { %v3064_v50 = vpack.c.bf16 %v2333_v48, %v2332_v46 }
0x2a43   :  { %3218 = vtanh.f32 %v3076_v11  ;;  %v2484_v12 = vmul.f32 -1.442695, %v3076_v11 }
0x2a44   :  { %3065 = vmatpush3.bf16.msra.mxu1 %v3064_v50 }
0x2a45   :  { %3220 = vpow2.f32 %v2484_v12  ;;  %3066 = vmatprep.subr.bf16.mxu1 %v3231_v0  ;;  %v2487_v0 = vld [vmem:[%s3713_s3 + $0x20] ss:$0 sm:$0xff] }
0x2a48   :  { %3068 = vmatpush3.bf16.msra.mxu1 %v3067_v52 }
0x2a4d   :  { %v3219_v37 = vpop.eup %3218 }
0x2a4e   :  { %2317 = vrot.lane.b32.xlu0 %v3219_v37, %s3234_s15 }
0x2a4f   :  { %v3221_v35 = vpop.eup %3220 }
0x2a50   :  { %v2311_v38 = vadd.f32 1.0, %v3221_v35 }
0x2a52   :  { %3222 = vrcp.f32 %v2311_v38 }
0x2a5c   :  { %v3223_v40 = vpop.eup %3222 }
0x2a5d   :  { %v2315_v44 = vmul.f32 %v3223_v40, %v2056_v16 }
0x2ac0   :  { %v2318_v42 = vpop.permute.xlu0 %2317 }
0x2ac1   :  { %v2320_v43 = vmul.f32 %v3223_v40, %v2318_v42 }
0x2ac3   :  { %2322 = vrot.lane.b32.xlu1 %v2320_v43, %s3234_s15 }
0x2b35   :  { %v2323_v45 = vpop.permute.xlu1 %2322 }
0x2b36   :  { %v2325_v47 = vadd.f32 %v2323_v45, %v2315_v44 }
0x2b38   :  { %3224 = vtanh.f32 %v2325_v47 }
0x2b42   :  { %v3225_v53 = vpop.eup %3224 }
0x2b43   :  { %2328 = vrot.lane.b32.xlu0 %v3225_v53, %s3234_s15 }
0x2bb5   :  { %v2329_v54 = vpop.permute.xlu0 %2328 }
0x2bb6   :  { %v2331_v21 = vmul.f32 %v3223_v40, %v2329_v54 }
0x2bb8   :  { %2342 = vrot.lane.b32.xlu1 %v2331_v21, %s3235_s24 }
0x2c2a   :  { %v2343_v14 = vpop.permute.xlu1 %2342 }
0x2c2b   :  { %2913 = vmatmul.mubr.msk.f32.vlgmr.msra.gmra.mrb[16].mxu1 %vm181_vm2, %v2343_v14 }
0x2cfe   :  { %v2412_v55 = vpop.f32.mrb[16].mxu1 }
0x2cff   :  { %v2413_v56 = vadd.f32 %v2485_v8, %v2412_v55  ;;  %v2914_v57 = vpop.f32.mrb[17].mxu1 }
0x2d01   :  { %3226 = vtanh.f32 %v2413_v56 }
0x2d0b   :  { %v3227_v58 = vpop.eup %3226 }
0x2d0c   :  { %v2421_v59 = vmul.f32 %v3227_v58, %v2487_v0 }
0x2d0e   :  { %v2422_v60 = vsel %vm47_vm1, %v2421_v59, 0.0 }
0x2d0f   :  { %2423 = vadd.xlane.f32.xlu0 %v2422_v60 }
0x2d9c   :  { %v2424_v62 = vpop.xlane.xlu0 %2423 }
0x2d9d   :  { %v2429_v63 = vadd.f32 %v2488_v61, %v2424_v62 }
0x2d9f   :  { %3228 = vtanh.f32 %v2429_v63 }
0x2da9   :  { %v3229_v1 = vpop.eup %3228 }
0x2daa   :  { %2432 = vst.msk [vmem:[%s3714_s4] sm:$0xff] %vm2431_vm3, %v3229_v1 }

</bundles_post_ra>
